<compile_context>
chip_gen: v6e
topology: v6e:2x2x1
jax: 0.10.0
libtpu: 0.0.40
codegen_flags: <defaults>
</compile_context>

<pallas_src>
import jax
import jax.numpy as jnp
from jax.experimental import pallas as pl
from jax.experimental.pallas import tpu as pltpu

HIDDEN_DIM = 32       # stands in for args.hidden_dim
IN_DIM = 784
H1_DIM = 400
DEFAULT_TILE_B = 256  # production tile size; the smoke test below uses a small tile


def _round_up(n, m):
    return ((n + m - 1) // m) * m


def vae_kernel(x_ref, eps_ref,
               w1_ref, b1_ref,
               w2h_ref, b2h_ref,      # fused mu||logvar head: (400, 2H), (1, 2H)
               w3_ref, b3_ref,
               w4_ref, b4_ref,
               recon_ref, heads_ref):
    x = x_ref[...]                                              # (TB, 784) bf16

    # encode: h1 = relu(fc1(x))   -- bf16 operands, f32 accumulate
    h1 = jnp.dot(x, w1_ref[...], preferred_element_type=jnp.float32) + b1_ref[...]
    h1 = jnp.maximum(h1, 0.0)                                   # (TB, 400) f32

    # fused mu/logvar heads: one (400, 2H) matmul instead of two (400, H) matmuls
    heads = jnp.dot(h1.astype(jnp.bfloat16), w2h_ref[...],
                    preferred_element_type=jnp.float32) + b2h_ref[...]   # (TB, 2H) f32
    mu = heads[:, :HIDDEN_DIM]
    logvar = heads[:, HIDDEN_DIM:]

    # reparameterize: z = mu + eps * exp(0.5 * logvar)   (f32 on VPU/EUP)
    std = jnp.exp(0.5 * logvar)
    z = mu + eps_ref[...] * std                                  # (TB, H) f32

    # decode: sigmoid(fc4(relu(fc3(z))))
    h3 = jnp.dot(z.astype(jnp.bfloat16), w3_ref[...],
                 preferred_element_type=jnp.float32) + b3_ref[...]
    h3 = jnp.maximum(h3, 0.0)                                    # (TB, 400) f32
    logits = jnp.dot(h3.astype(jnp.bfloat16), w4_ref[...],
                     preferred_element_type=jnp.float32) + b4_ref[...]   # (TB, 784) f32

    recon_ref[...] = jax.nn.sigmoid(logits)
    heads_ref[...] = heads


def vae_forward(x_img, eps, params, tile_b=None):
    """x_img: (B,1,28,28) float32; eps: (B,HIDDEN_DIM) standard-normal noise.
    Returns (recon, mu, logvar), all float32."""
    B = x_img.shape[0]
    x = x_img.reshape(B, IN_DIM).astype(jnp.bfloat16)            # x.view(-1, 784), bf16 operand
    eps = eps.astype(jnp.float32)

    (w1, b1, w2h, b2h, w3, b3, w4, b4) = params

    if tile_b is None:
        tile_b = DEFAULT_TILE_B
    # Tile must be a multiple of 8 sublanes; no bigger than the (rounded-up) batch.
    tile_b = max(8, min(_round_up(tile_b, 8), _round_up(B, 8)))
    Bp = _round_up(B, tile_b)
    if Bp != B:
        x = jnp.pad(x, ((0, Bp - B), (0, 0)))
        eps = jnp.pad(eps, ((0, Bp - B), (0, 0)))

    grid = (Bp // tile_b,)

    def act_spec(width):
        return pl.BlockSpec((tile_b, width), lambda i: (i, 0))

    def resident_spec(arr):
        # Full array as one block, same block every grid step -> stays in VMEM.
        return pl.BlockSpec(arr.shape, lambda i: (0, 0))

    recon, heads = pl.pallas_call(
        vae_kernel,
        grid=grid,
        out_shape=(
            jax.ShapeDtypeStruct((Bp, IN_DIM), jnp.float32),
            jax.ShapeDtypeStruct((Bp, 2 * HIDDEN_DIM), jnp.float32),
        ),
        in_specs=[
            act_spec(IN_DIM),                 # x tile
            act_spec(HIDDEN_DIM),             # eps tile
            resident_spec(w1), resident_spec(b1),
            resident_spec(w2h), resident_spec(b2h),
            resident_spec(w3), resident_spec(b3),
            resident_spec(w4), resident_spec(b4),
        ],
        out_specs=(act_spec(IN_DIM), act_spec(2 * HIDDEN_DIM)),
        compiler_params=pltpu.CompilerParams(
            dimension_semantics=("parallel",),        # batch tiles are independent (v7x dual-TC)
            vmem_limit_bytes=32 * 1024 * 1024,        # weights resident + double-buffered tiles
        ),
    )(x, eps, w1, b1, w2h, b2h, w3, b3, w4, b4)

    recon = recon[:B]
    mu = heads[:B, :HIDDEN_DIM]
    logvar = heads[:B, HIDDEN_DIM:]
    return recon, mu, logvar


def init_params(key):
    """Deterministic init mimicking nn.Linear default: U(-1/sqrt(fan_in), 1/sqrt(fan_in)).
    Weights stored (in_features, out_features) in bf16 (MXU operands); biases f32.
    fc21/fc22 are fused into one head weight/bias."""
    def linear(key, fan_in, fan_out):
        kw, kb = jax.random.split(key)
        bound = 1.0 / jnp.sqrt(fan_in)
        w = jax.random.uniform(kw, (fan_in, fan_out), jnp.float32, -bound, bound)
        b = jax.random.uniform(kb, (1, fan_out), jnp.float32, -bound, bound)
        return w, b

    k1, k21, k22, k3, k4 = jax.random.split(key, 5)
    w1, b1 = linear(k1, IN_DIM, H1_DIM)          # fc1:  784 -> 400
    w21, b21 = linear(k21, H1_DIM, HIDDEN_DIM)   # fc21: 400 -> hidden
    w22, b22 = linear(k22, H1_DIM, HIDDEN_DIM)   # fc22: 400 -> hidden
    w3, b3 = linear(k3, HIDDEN_DIM, H1_DIM)      # fc3:  hidden -> 400
    w4, b4 = linear(k4, H1_DIM, IN_DIM)          # fc4:  400 -> 784

    w2h = jnp.concatenate([w21, w22], axis=1)    # (400, 2H) fused mu||logvar head
    b2h = jnp.concatenate([b21, b22], axis=1)    # (1, 2H)

    return (w1.astype(jnp.bfloat16), b1,
            w2h.astype(jnp.bfloat16), b2h,
            w3.astype(jnp.bfloat16), b3,
            w4.astype(jnp.bfloat16), b4)


def vae_reference(x_img, eps, params):
    """Plain-JAX reference with the same precision policy (bf16 matmul operands, f32 accum)."""
    B = x_img.shape[0]
    x = x_img.reshape(B, IN_DIM).astype(jnp.bfloat16)
    (w1, b1, w2h, b2h, w3, b3, w4, b4) = params
    h1 = jnp.maximum(jnp.dot(x, w1, preferred_element_type=jnp.float32) + b1, 0.0)
    heads = jnp.dot(h1.astype(jnp.bfloat16), w2h, preferred_element_type=jnp.float32) + b2h
    mu = heads[:, :HIDDEN_DIM]
    logvar = heads[:, HIDDEN_DIM:]
    z = mu + eps * jnp.exp(0.5 * logvar)
    h3 = jnp.maximum(jnp.dot(z.astype(jnp.bfloat16), w3, preferred_element_type=jnp.float32) + b3, 0.0)
    logits = jnp.dot(h3.astype(jnp.bfloat16), w4, preferred_element_type=jnp.float32) + b4
    return jax.nn.sigmoid(logits), mu, logvar


if __name__ == "__main__":
    key = jax.random.PRNGKey(0)
    k_params, k_x, k_eps = jax.random.split(key, 3)

    B = 16
    TILE_B = 8   # small tile for the smoke test (grid=(2,)); production uses 256-1024
    params = init_params(k_params)
    x_img = jax.random.uniform(k_x, (B, 1, 28, 28), jnp.float32)   # synthetic "MNIST"-like input
    eps = jax.random.normal(k_eps, (B, HIDDEN_DIM), jnp.float32)   # torch.randn_like(std)

    recon, mu, logvar = vae_forward(x_img, eps, params, tile_b=TILE_B)
    jax.block_until_ready((recon, mu, logvar))

    recon_r, mu_r, lv_r = vae_reference(x_img, eps, params)

    assert recon.shape == (B, IN_DIM)
    assert mu.shape == (B, HIDDEN_DIM) and logvar.shape == (B, HIDDEN_DIM)
    assert jnp.allclose(recon, recon_r, atol=1e-2), float(jnp.abs(recon - recon_r).max())
    assert jnp.allclose(mu, mu_r, atol=1e-2), float(jnp.abs(mu - mu_r).max())
    assert jnp.allclose(logvar, lv_r, atol=1e-2), float(jnp.abs(logvar - lv_r).max())

    print("KERNEL_OK")
</pallas_src>

<mosaic_0001>
module attributes {stable_mosaic.version = 11 : i64} {
  func.func @vae_kernel(%arg0: i32, %arg1: memref<8x784xbf16, #tpu.memory_space<vmem>>, %arg2: memref<8x32xf32, #tpu.memory_space<vmem>>, %arg3: memref<784x400xbf16, #tpu.memory_space<vmem>>, %arg4: memref<1x400xf32, #tpu.memory_space<vmem>>, %arg5: memref<400x64xbf16, #tpu.memory_space<vmem>>, %arg6: memref<1x64xf32, #tpu.memory_space<vmem>>, %arg7: memref<32x400xbf16, #tpu.memory_space<vmem>>, %arg8: memref<1x400xf32, #tpu.memory_space<vmem>>, %arg9: memref<400x784xbf16, #tpu.memory_space<vmem>>, %arg10: memref<1x784xf32, #tpu.memory_space<vmem>>, %arg11: memref<8x784xf32, #tpu.memory_space<vmem>>, %arg12: memref<8x64xf32, #tpu.memory_space<vmem>>) attributes {dimension_semantics = [#tpu.dimension_semantics<parallel>], iteration_bounds = array<i64: 2>, scalar_prefetch = 0 : i64, scratch_operands = 0 : i64, tpu.core_type = #tpu.core_type<tc>, window_params = [{transform_indices = @transform_0, window_bounds = array<i64: 8, 784>}, {transform_indices = @transform_1, window_bounds = array<i64: 8, 32>}, {pipeline_mode = #tpu.pipeline_mode<synchronous>, transform_indices = @transform_2, window_bounds = array<i64: 784, 400>}, {pipeline_mode = #tpu.pipeline_mode<synchronous>, transform_indices = @transform_3, window_bounds = array<i64: 1, 400>}, {pipeline_mode = #tpu.pipeline_mode<synchronous>, transform_indices = @transform_4, window_bounds = array<i64: 400, 64>}, {pipeline_mode = #tpu.pipeline_mode<synchronous>, transform_indices = @transform_5, window_bounds = array<i64: 1, 64>}, {pipeline_mode = #tpu.pipeline_mode<synchronous>, transform_indices = @transform_6, window_bounds = array<i64: 32, 400>}, {pipeline_mode = #tpu.pipeline_mode<synchronous>, transform_indices = @transform_7, window_bounds = array<i64: 1, 400>}, {pipeline_mode = #tpu.pipeline_mode<synchronous>, transform_indices = @transform_8, window_bounds = array<i64: 400, 784>}, {pipeline_mode = #tpu.pipeline_mode<synchronous>, transform_indices = @transform_9, window_bounds = array<i64: 1, 784>}, {transform_indices = @transform_10, window_bounds = array<i64: 8, 784>}, {transform_indices = @transform_11, window_bounds = array<i64: 8, 64>}]} {
    %c0 = arith.constant 0 : index
    %c0_0 = arith.constant 0 : index
    %0 = vector.load %arg1[%c0, %c0_0] : memref<8x784xbf16, #tpu.memory_space<vmem>>, vector<8x784xbf16>
    %c0_1 = arith.constant 0 : index
    %c0_2 = arith.constant 0 : index
    %1 = vector.load %arg3[%c0_1, %c0_2] : memref<784x400xbf16, #tpu.memory_space<vmem>>, vector<784x400xbf16>
    %cst = arith.constant dense<0.000000e+00> : vector<8x400xf32>
    %2 = tpu.matmul %0, %1, %cst {dimension_numbers = #tpu.dot_dimension_numbers<[1], [0], [0], [1], [0, 0, 1, 1], [], []>} : vector<8x784xbf16>, vector<784x400xbf16>, vector<8x400xf32> -> vector<8x400xf32>
    %c0_3 = arith.constant 0 : index
    %c0_4 = arith.constant 0 : index
    %3 = vector.load %arg4[%c0_3, %c0_4] : memref<1x400xf32, #tpu.memory_space<vmem>>, vector<1x400xf32>
    %4 = vector.broadcast %3 : vector<1x400xf32> to vector<8x400xf32>
    %5 = arith.addf %2, %4 : vector<8x400xf32>
    %cst_5 = arith.constant 0.000000e+00 : f32
    %6 = vector.broadcast %cst_5 : f32 to vector<8x400xf32>
    %7 = arith.maximumf %5, %6 : vector<8x400xf32>
    %8 = arith.truncf %7 : vector<8x400xf32> to vector<8x400xbf16>
    %c0_6 = arith.constant 0 : index
    %c0_7 = arith.constant 0 : index
    %9 = vector.load %arg5[%c0_6, %c0_7] : memref<400x64xbf16, #tpu.memory_space<vmem>>, vector<400x64xbf16>
    %cst_8 = arith.constant dense<0.000000e+00> : vector<8x64xf32>
    %10 = tpu.matmul %8, %9, %cst_8 {dimension_numbers = #tpu.dot_dimension_numbers<[1], [0], [0], [1], [0, 0, 1, 1], [], []>} : vector<8x400xbf16>, vector<400x64xbf16>, vector<8x64xf32> -> vector<8x64xf32>
    %c0_9 = arith.constant 0 : index
    %c0_10 = arith.constant 0 : index
    %11 = vector.load %arg6[%c0_9, %c0_10] : memref<1x64xf32, #tpu.memory_space<vmem>>, vector<1x64xf32>
    %12 = vector.broadcast %11 : vector<1x64xf32> to vector<8x64xf32>
    %13 = arith.addf %10, %12 : vector<8x64xf32>
    %14 = vector.extract_strided_slice %13 {offsets = [0, 0], sizes = [8, 32], strides = [1, 1]} : vector<8x64xf32> to vector<8x32xf32>
    %15 = vector.extract_strided_slice %13 {offsets = [0, 32], sizes = [8, 32], strides = [1, 1]} : vector<8x64xf32> to vector<8x32xf32>
    %cst_11 = arith.constant 5.000000e-01 : f32
    %16 = vector.broadcast %cst_11 : f32 to vector<8x32xf32>
    %17 = arith.mulf %16, %15 : vector<8x32xf32>
    %18 = math.exp %17 : vector<8x32xf32>
    %c0_12 = arith.constant 0 : index
    %c0_13 = arith.constant 0 : index
    %19 = vector.load %arg2[%c0_12, %c0_13] : memref<8x32xf32, #tpu.memory_space<vmem>>, vector<8x32xf32>
    %20 = arith.mulf %19, %18 : vector<8x32xf32>
    %21 = arith.addf %14, %20 : vector<8x32xf32>
    %22 = arith.truncf %21 : vector<8x32xf32> to vector<8x32xbf16>
    %c0_14 = arith.constant 0 : index
    %c0_15 = arith.constant 0 : index
    %23 = vector.load %arg7[%c0_14, %c0_15] : memref<32x400xbf16, #tpu.memory_space<vmem>>, vector<32x400xbf16>
    %cst_16 = arith.constant dense<0.000000e+00> : vector<8x400xf32>
    %24 = tpu.matmul %22, %23, %cst_16 {dimension_numbers = #tpu.dot_dimension_numbers<[1], [0], [0], [1], [0, 0, 1, 1], [], []>} : vector<8x32xbf16>, vector<32x400xbf16>, vector<8x400xf32> -> vector<8x400xf32>
    %c0_17 = arith.constant 0 : index
    %c0_18 = arith.constant 0 : index
    %25 = vector.load %arg8[%c0_17, %c0_18] : memref<1x400xf32, #tpu.memory_space<vmem>>, vector<1x400xf32>
    %26 = vector.broadcast %25 : vector<1x400xf32> to vector<8x400xf32>
    %27 = arith.addf %24, %26 : vector<8x400xf32>
    %cst_19 = arith.constant 0.000000e+00 : f32
    %28 = vector.broadcast %cst_19 : f32 to vector<8x400xf32>
    %29 = arith.maximumf %27, %28 : vector<8x400xf32>
    %30 = arith.truncf %29 : vector<8x400xf32> to vector<8x400xbf16>
    %c0_20 = arith.constant 0 : index
    %c0_21 = arith.constant 0 : index
    %31 = vector.load %arg9[%c0_20, %c0_21] : memref<400x784xbf16, #tpu.memory_space<vmem>>, vector<400x784xbf16>
    %cst_22 = arith.constant dense<0.000000e+00> : vector<8x784xf32>
    %32 = tpu.matmul %30, %31, %cst_22 {dimension_numbers = #tpu.dot_dimension_numbers<[1], [0], [0], [1], [0, 0, 1, 1], [], []>} : vector<8x400xbf16>, vector<400x784xbf16>, vector<8x784xf32> -> vector<8x784xf32>
    %c0_23 = arith.constant 0 : index
    %c0_24 = arith.constant 0 : index
    %33 = vector.load %arg10[%c0_23, %c0_24] : memref<1x784xf32, #tpu.memory_space<vmem>>, vector<1x784xf32>
    %34 = vector.broadcast %33 : vector<1x784xf32> to vector<8x784xf32>
    %35 = arith.addf %32, %34 : vector<8x784xf32>
    %36 = arith.negf %35 : vector<8x784xf32>
    %37 = math.exp %36 : vector<8x784xf32>
    %cst_25 = arith.constant 1.000000e+00 : f32
    %38 = vector.broadcast %cst_25 : f32 to vector<8x784xf32>
    %39 = arith.addf %38, %37 : vector<8x784xf32>
    %40 = arith.divf %38, %39 : vector<8x784xf32>
    %c0_26 = arith.constant 0 : index
    %c0_27 = arith.constant 0 : index
    %41 = vector.load %arg11[%c0_26, %c0_27] : memref<8x784xf32, #tpu.memory_space<vmem>>, vector<8x784xf32>
    tpu.vector_store %arg11[%c0_26, %c0_27], %40 {strides = array<i32>} : memref<8x784xf32, #tpu.memory_space<vmem>>, vector<8x784xf32>,
    %c0_28 = arith.constant 0 : index
    %c0_29 = arith.constant 0 : index
    %42 = vector.load %arg12[%c0_28, %c0_29] : memref<8x64xf32, #tpu.memory_space<vmem>>, vector<8x64xf32>
    tpu.vector_store %arg12[%c0_28, %c0_29], %13 {strides = array<i32>} : memref<8x64xf32, #tpu.memory_space<vmem>>, vector<8x64xf32>,
    return
  }
  func.func @transform_0(%arg0: i32) -> (i32, i32) {
    %c0_i32 = arith.constant 0 : i32
    %c0_i32_0 = arith.constant 0 : i32
    return %arg0, %c0_i32 : i32, i32
  }
  func.func @transform_1(%arg0: i32) -> (i32, i32) {
    %c0_i32 = arith.constant 0 : i32
    %c0_i32_0 = arith.constant 0 : i32
    return %arg0, %c0_i32 : i32, i32
  }
  func.func @transform_2(%arg0: i32) -> (i32, i32) {
    %c0_i32 = arith.constant 0 : i32
    %c0_i32_0 = arith.constant 0 : i32
    %c0_i32_1 = arith.constant 0 : i32
    return %c0_i32, %c0_i32_0 : i32, i32
  }
  func.func @transform_3(%arg0: i32) -> (i32, i32) {
    %c0_i32 = arith.constant 0 : i32
    %c0_i32_0 = arith.constant 0 : i32
    %c0_i32_1 = arith.constant 0 : i32
    return %c0_i32, %c0_i32_0 : i32, i32
  }
  func.func @transform_4(%arg0: i32) -> (i32, i32) {
    %c0_i32 = arith.constant 0 : i32
    %c0_i32_0 = arith.constant 0 : i32
    %c0_i32_1 = arith.constant 0 : i32
    return %c0_i32, %c0_i32_0 : i32, i32
  }
  func.func @transform_5(%arg0: i32) -> (i32, i32) {
    %c0_i32 = arith.constant 0 : i32
    %c0_i32_0 = arith.constant 0 : i32
    %c0_i32_1 = arith.constant 0 : i32
    return %c0_i32, %c0_i32_0 : i32, i32
  }
  func.func @transform_6(%arg0: i32) -> (i32, i32) {
    %c0_i32 = arith.constant 0 : i32
    %c0_i32_0 = arith.constant 0 : i32
    %c0_i32_1 = arith.constant 0 : i32
    return %c0_i32, %c0_i32_0 : i32, i32
  }
  func.func @transform_7(%arg0: i32) -> (i32, i32) {
    %c0_i32 = arith.constant 0 : i32
    %c0_i32_0 = arith.constant 0 : i32
    %c0_i32_1 = arith.constant 0 : i32
    return %c0_i32, %c0_i32_0 : i32, i32
  }
  func.func @transform_8(%arg0: i32) -> (i32, i32) {
    %c0_i32 = arith.constant 0 : i32
    %c0_i32_0 = arith.constant 0 : i32
    %c0_i32_1 = arith.constant 0 : i32
    return %c0_i32, %c0_i32_0 : i32, i32
  }
  func.func @transform_9(%arg0: i32) -> (i32, i32) {
    %c0_i32 = arith.constant 0 : i32
    %c0_i32_0 = arith.constant 0 : i32
    %c0_i32_1 = arith.constant 0 : i32
    return %c0_i32, %c0_i32_0 : i32, i32
  }
  func.func @transform_10(%arg0: i32) -> (i32, i32) {
    %c0_i32 = arith.constant 0 : i32
    %c0_i32_0 = arith.constant 0 : i32
    return %arg0, %c0_i32 : i32, i32
  }
  func.func @transform_11(%arg0: i32) -> (i32, i32) {
    %c0_i32 = arith.constant 0 : i32
    %c0_i32_0 = arith.constant 0 : i32
    return %arg0, %c0_i32 : i32, i32
  }
}

</mosaic_0001>

<bundles_post_ra>
// kernel: tpu_custom_call.1
= control target key start
LH: loop header
LB: loop body
LE: loop exit
PB: predicated region body
PF: predicated region fallthrough
CT: control target
= control target key end

     0   :  { %s6900_s0 = inlined_call_operand.vmem [shape: bf16[16,784], index: 0, kind: input, shape index: {}]   ;;  %s6901_s1 = inlined_call_operand.vmem [shape: f32[16,32], index: 1, kind: input, shape index: {}]   ;;  %s6902_s2 = inlined_call_operand.vmem [shape: bf16[784,400], index: 2, kind: input, shape index: {}]   ;;  %s6903_s3 = inlined_call_operand.vmem [shape: f32[1,400], index: 3, kind: input, shape index: {}]   ;;  %s6904_s4 = inlined_call_operand.vmem [shape: bf16[400,64], index: 4, kind: input, shape index: {}]   ;;  %s6905_s5 = inlined_call_operand.vmem [shape: f32[1,64], index: 5, kind: input, shape index: {}]   ;;  %s6906_s6 = inlined_call_operand.vmem [shape: bf16[32,400], index: 6, kind: input, shape index: {}]   ;;  %s6907_s7 = inlined_call_operand.vmem [shape: f32[1,400], index: 7, kind: input, shape index: {}]   ;;  %s6908_s8 = inlined_call_operand.vmem [shape: bf16[400,784], index: 8, kind: input, shape index: {}]   ;;  %s6909_s9 = inlined_call_operand.vmem [shape: f32[1,784], index: 9, kind: input, shape index: {}]   ;;  %s6910_s10 = inlined_call_operand.hbm [shape: f32[16,784], index: 10, kind: output, shape index: {0}]   ;;  %s6911_s11 = inlined_call_operand.hbm [shape: f32[16,64], index: 11, kind: output, shape index: {1}]  }
   0x1   :  { %6915 = sst [smem:[#allocation11_spill]] %s6900_s0 }
   0x2   :  { %6916 = sst [smem:[#allocation12_spill]] %s6901_s1 }
   0x3   :  { %17 = vsyncpa [#allocation3], 0 }
   0x4   :  { %19 = vsyncpa [#allocation3 + $0x1], 0 }
   0x5   :  { %20 = vsyncpa [#allocation5], 0 }
   0x6   :  { %22 = vsyncpa [#allocation5 + $0x1], 0  ;;  %s5406_s17 = smov 0   ;;  %s5408_s18 = smov 0  }
   0x7   :  { %s5410_s19 = smov 0   ;;  %s5412_s20 = smov 0  }
   0x8 LB: > { %6917 = sst [smem:[#allocation8_spill]] %s5336_s19  ;;  %s5427_s21 = sadd.s32 4294967295, %s5340_s20   ;;  %s5340_s20 = sphi %s5412_s20, %s6924_s20   ;;  %s5336_s19 = sphi %s5410_s19, %s6926_s19   ;;  %s5332_s18 = sphi %s5408_s18, %s6928_s18   ;;  %s5328_s17 = sphi %s5406_s17, %s6927_s17  }
   0x9   : > { %s4098_s22 = sadd.s32 4294967294, %s5340_s20   ;;  %s5431_s23 = sadd.s32 1, %s5340_s20  }
   0xa   : > { %6918 = sst [smem:[#allocation9_spill]] %s5431_s23  ;;  %s255_s24 = sadd.s32 1, %s5336_s19 }
   0xb   : > { %s252_s25 = ssub.s32 %s5340_s20, %s5431_s23  ;;  %p265_p0 = scmp.ne.s32.totalorder %s5336_s19, %s5332_s18 }
   0xc   : > { %p253_p1 = scmp.eq.s32.totalorder %s252_s25, 0  ;;  %p266_p2 = scmp.eq.s32.totalorder %s5427_s21, 1 }
   0xd   : > { %p271_p3 = scmp.ne.s32.totalorder %s5332_s18, %s5328_s17  ;;  %p272_p4 = scmp.eq.s32.totalorder %s4098_s22, 1 }
   0xe   : > { %s5442_s26 = scalar_select %p253_p1, %s5336_s19, %s255_s24  }
   0xf   : > { %p5444_p5 = por %p266_p2, %p265_p0  ;;  %p5448_p6 = por %p272_p4, %p271_p3 }
  0x10   : > { %6919 = sst [smem:[#allocation10_spill]] %s5442_s26  ;;  %p4101_p7 = scmp.ge.s32.totalorder %s5340_s20, 1 }
  0x11   : > { %p355_p8 = scmp.lt.s32.totalorder %s5340_s20, 3 }
  0x13   : > { %p356_p9 = pnand %p4101_p7, %p355_p8 }
  0x14   : > { %p404_p10 = scmp.lt.s32.totalorder (!%p356_p9), %s5427_s21, 1  ;;  %s6922_s0 = sld [smem:[#allocation11_spill]] (!%p356_p9) }
  0x15   : > { %359 = sbr.rel (%p356_p9) target bundleno = 1360 (0x550), region = 60  ;;  %s5343_s16 = smov (!%p356_p9), 96  }
  0x16   : > { %s6923_s1 = sld [smem:[#allocation12_spill]] (!%p356_p9)  ;;  %s4535_s19 = sshll.u32 (!%p356_p9), %s5427_s21, 7 }
  0x17   : > { %s3993_s22 = scalar_lea.hbm (!%p356_p9), %s6911_s11, %s4535_s19  ;;  %s5344_s26 = smov (!%p356_p9), [#allocation4]  }
  0x18   : > { %s5254_s13 = sshll.u32 (!%p356_p9), %s5344_s26, 4  ;;  %s5255_s13 = int_to_ptr.vmem [resolvable:$false] %s5254_s13 }
  0x1a   : > { %v4631_v0 = vld [vmem:[%s6902_s2 + $0xe4] ss:$16 sps:$4 sm:$0xff]   ;;  %v4635_v2 = vld [vmem:[%s6902_s2 + $0xe0] ss:$16 sps:$4 sm:$0xff]   ;;  %s5564_s12 = scalar_select %p404_p10, %s5427_s21, 1  ;;  %vm1640_vm0 = vcmask 130048  }
  0x1b   : > { %v4633_v1 = vld [vmem:[%s6902_s2 + $0x2e4] ss:$16 sps:$4 sm:$0xff]   ;;  %1644 = vmatprep.subr.bf16.mxu0 %v4631_v0  ;;  %v4636_v3 = vld [vmem:[%s6902_s2 + $0x2e0] ss:$16 sps:$4 sm:$0xff]   ;;  %vm3960_vm1 = vcmask 523264   ;;  %vm2351_vm2 = vcmask 261120  }
  0x1c   : > { %1685 = vmatprep.subr.bf16.mxu1 %v4633_v1  ;;  %v4637_v4 = vld [vmem:[%s6902_s2 + $0xc4] ss:$16 sps:$4 sm:$0xff]   ;;  %1645 = vmatpush1.bf16.msra.mxu0 %v4635_v2  ;;  %v4641_v6 = vld [vmem:[%s6902_s2 + $0xc0] ss:$16 sps:$4 sm:$0xff]   ;;  %s4583_s25 = smul.u32 28, %s5564_s12  ;;  %s4104_s14 = sshll.u32 %s5564_s12, 3 }
  0x1d   : > { %1686 = vmatpush1.bf16.msra.mxu1 %v4636_v3  ;;  %v4639_v5 = vld [vmem:[%s6902_s2 + $0x2c4] ss:$16 sps:$4 sm:$0xff]   ;;  %1646 = vmatprep.subr.bf16.mxu0 %v4637_v4  ;;  %v4642_v7 = vld [vmem:[%s6902_s2 + $0x2c0] ss:$16 sps:$4 sm:$0xff]  }
  0x1e   : > { %1687 = vmatprep.subr.bf16.mxu1 %v4639_v5  ;;  %v4643_v8 = vld [vmem:[%s6902_s2 + $0xa4] ss:$16 sps:$4 sm:$0xff]   ;;  %v4647_v10 = vld [vmem:[%s6902_s2 + $0xa0] ss:$16 sps:$4 sm:$0xff]   ;;  %s5594_s23 = scalar_lea.vmem %s6922_s0, %s4583_s25 }
  0x1f   : > { %v4645_v9 = vld [vmem:[%s6902_s2 + $0x2a4] ss:$16 sps:$4 sm:$0xff]   ;;  %v4648_v11 = vld [vmem:[%s6902_s2 + $0x2a0] ss:$16 sps:$4 sm:$0xff]   ;;  %v415_v50 = vld [vmem:[%s5594_s23 + $0x8] sm:$0xff] }
  0x20   : > { %1647 = vmatpush1.bf16.msra.mxu0 %v4641_v6  ;;  %v4649_v12 = vld [vmem:[%s6902_s2 + $0x84] ss:$16 sps:$4 sm:$0xff]   ;;  %v4653_v14 = vld [vmem:[%s6902_s2 + $0x80] ss:$16 sps:$4 sm:$0xff]   ;;  %v5615_v52 = vcombine.high %v415_v50, %v415_v50 }
  0x21   : > { %1688 = vmatpush1.bf16.msra.mxu1 %v4642_v7  ;;  %1648 = vmatprep.subr.bf16.mxu0 %v4643_v8  ;;  %v4651_v13 = vld [vmem:[%s6902_s2 + $0x284] ss:$16 sps:$4 sm:$0xff]   ;;  %v4654_v15 = vld [vmem:[%s6902_s2 + $0x280] ss:$16 sps:$4 sm:$0xff]   ;;  %v5672_v7 = vcombine.low %v415_v50, %v415_v50  ;;  %v4789_v50 = vld [vmem:[%s6902_s2 + $0x1e8] ss:$16 sps:$4 sm:$0xff]  }
  0x22   : > { %1689 = vmatprep.subr.bf16.mxu1 %v4645_v9  ;;  %v4655_v16 = vld [vmem:[%s6902_s2 + $0x64] ss:$16 sps:$4 sm:$0xff]   ;;  %v4659_v18 = vld [vmem:[%s6902_s2 + $0x60] ss:$16 sps:$4 sm:$0xff]   ;;  %1717 = vmatprep.mubr.bf16.mxu1 %v5615_v52 }
  0x23   : > { %v4657_v17 = vld [vmem:[%s6902_s2 + $0x264] ss:$16 sps:$4 sm:$0xff]   ;;  %v4660_v19 = vld [vmem:[%s6902_s2 + $0x260] ss:$16 sps:$4 sm:$0xff]  }
  0x24   : > { %1649 = vmatpush1.bf16.msra.mxu0 %v4647_v10  ;;  %v4661_v20 = vld [vmem:[%s6902_s2 + $0x44] ss:$16 sps:$4 sm:$0xff]   ;;  %v4665_v22 = vld [vmem:[%s6902_s2 + $0x40] ss:$16 sps:$4 sm:$0xff]  }
  0x25   : > { %1690 = vmatpush1.bf16.msra.mxu1 %v4648_v11  ;;  %1650 = vmatprep.subr.bf16.mxu0 %v4649_v12  ;;  %v4663_v21 = vld [vmem:[%s6902_s2 + $0x244] ss:$16 sps:$4 sm:$0xff]   ;;  %v4666_v23 = vld [vmem:[%s6902_s2 + $0x240] ss:$16 sps:$4 sm:$0xff]   ;;  %v4743_v11 = vld [vmem:[%s6902_s2 + $0xec] ss:$16 sps:$4 sm:$0xff]  }
  0x26   : > { %1691 = vmatprep.subr.bf16.mxu1 %v4651_v13  ;;  %v4667_v24 = vld [vmem:[%s6902_s2 + $0x24] ss:$16 sps:$4 sm:$0xff]   ;;  %v4671_v26 = vld [vmem:[%s6902_s2 + $0x20] ss:$16 sps:$4 sm:$0xff]   ;;  %v5342_v13 = vmov 0  }
  0x27   : > { %v4669_v25 = vld [vmem:[%s6902_s2 + $0x224] ss:$16 sps:$4 sm:$0xff]   ;;  %v4672_v27 = vld [vmem:[%s6902_s2 + $0x220] ss:$16 sps:$4 sm:$0xff]  }
  0x28   : > { %1651 = vmatpush1.bf16.msra.mxu0 %v4653_v14  ;;  %v4673_v28 = vld [vmem:[%s6902_s2 + $0x4] ss:$16 sps:$4 sm:$0xff]   ;;  %v4677_v30 = vld [vmem:[%s6902_s2] ss:$16 sps:$4 sm:$0xff]  }
  0x29   : > { %1692 = vmatpush1.bf16.msra.mxu1 %v4654_v15  ;;  %1652 = vmatprep.subr.bf16.mxu0 %v4655_v16  ;;  %v4675_v29 = vld [vmem:[%s6902_s2 + $0x204] ss:$16 sps:$4 sm:$0xff]   ;;  %v4678_v31 = vld [vmem:[%s6902_s2 + $0x200] ss:$16 sps:$4 sm:$0xff]   ;;  %v4729_v15 = vld [vmem:[%s5594_s23 + $0x18] ss:$0 sps:$4 sm:$0xff]  }
  0x2a   : > { %1693 = vmatprep.subr.bf16.mxu1 %v4657_v17  ;;  %v4679_v32 = vld [vmem:[%s6902_s2 + $0x1e4] ss:$16 sps:$4 sm:$0xff]   ;;  %v4683_v34 = vld [vmem:[%s6902_s2 + $0x1e0] ss:$16 sps:$4 sm:$0xff]   ;;  %v4741_v16 = vld [vmem:[%s6902_s2 + $0xe8] ss:$16 sps:$4 sm:$0xff]  }
  0x2b   : > { %v4681_v33 = vld [vmem:[%s6902_s2 + $0x3e4] ss:$16 sps:$4 sm:$0xff]   ;;  %v4684_v35 = vld [vmem:[%s6902_s2 + $0x3e0] ss:$16 sps:$4 sm:$0xff]  }
  0x2c   : > { %1653 = vmatpush1.bf16.msra.mxu0 %v4659_v18  ;;  %v4685_v36 = vld [vmem:[%s6902_s2 + $0x1c4] ss:$16 sps:$4 sm:$0xff]   ;;  %v4689_v38 = vld [vmem:[%s6902_s2 + $0x1c0] ss:$16 sps:$4 sm:$0xff]   ;;  %v4749_v18 = vld [vmem:[%s6902_s2 + $0xcc] ss:$16 sps:$4 sm:$0xff]  }
  0x2d   : > { %1694 = vmatpush1.bf16.msra.mxu1 %v4660_v19  ;;  %1654 = vmatprep.subr.bf16.mxu0 %v4661_v20  ;;  %v4687_v37 = vld [vmem:[%s6902_s2 + $0x3c4] ss:$16 sps:$4 sm:$0xff]   ;;  %v4690_v39 = vld [vmem:[%s6902_s2 + $0x3c0] ss:$16 sps:$4 sm:$0xff]   ;;  %v4747_v20 = vld [vmem:[%s6902_s2 + $0xc8] ss:$16 sps:$4 sm:$0xff]  }
  0x2e   : > { %1695 = vmatprep.subr.bf16.mxu1 %v4663_v21  ;;  %v4691_v40 = vld [vmem:[%s6902_s2 + $0x1a4] ss:$16 sps:$4 sm:$0xff]   ;;  %v4695_v42 = vld [vmem:[%s6902_s2 + $0x1a0] ss:$16 sps:$4 sm:$0xff]  }
  0x2f   : > { %v4693_v41 = vld [vmem:[%s6902_s2 + $0x3a4] ss:$16 sps:$4 sm:$0xff]   ;;  %v4696_v43 = vld [vmem:[%s6902_s2 + $0x3a0] ss:$16 sps:$4 sm:$0xff]  }
  0x30   : > { %1655 = vmatpush1.bf16.msra.mxu0 %v4665_v22  ;;  %v4697_v44 = vld [vmem:[%s6902_s2 + $0x184] ss:$16 sps:$4 sm:$0xff]   ;;  %v4701_v46 = vld [vmem:[%s6902_s2 + $0x180] ss:$16 sps:$4 sm:$0xff]   ;;  %v4755_v22 = vld [vmem:[%s6902_s2 + $0xac] ss:$16 sps:$4 sm:$0xff]  }
  0x31   : > { %1696 = vmatpush1.bf16.msra.mxu1 %v4666_v23  ;;  %1656 = vmatprep.subr.bf16.mxu0 %v4667_v24  ;;  %v4699_v45 = vld [vmem:[%s6902_s2 + $0x384] ss:$16 sps:$4 sm:$0xff]   ;;  %v4702_v48 = vld [vmem:[%s6902_s2 + $0x380] ss:$16 sps:$4 sm:$0xff]   ;;  %v4753_v24 = vld [vmem:[%s6902_s2 + $0xa8] ss:$16 sps:$4 sm:$0xff]  }
  0x32   : > { %1697 = vmatprep.subr.bf16.mxu1 %v4669_v25  ;;  %v414_v47 = vld [vmem:[%s5594_s23] sm:$0xff] }
  0x33   : > { %v5609_v49 = vcombine.high %v414_v47, %v414_v47  ;;  %v4703_v51 = vld [vmem:[%s6902_s2 + $0x164] ss:$16 sps:$4 sm:$0xff]   ;;  %v4707_v54 = vld [vmem:[%s6902_s2 + $0x160] ss:$16 sps:$4 sm:$0xff]   ;;  %v5670_v6 = vcombine.low %v414_v47, %v414_v47 }
  0x34   : > { %1657 = vmatpush1.bf16.msra.mxu0 %v4671_v26  ;;  %v4705_v53 = vld [vmem:[%s6902_s2 + $0x364] ss:$16 sps:$4 sm:$0xff]   ;;  %v4708_v55 = vld [vmem:[%s6902_s2 + $0x360] ss:$16 sps:$4 sm:$0xff]   ;;  %v4761_v26 = vld [vmem:[%s6902_s2 + $0x8c] ss:$16 sps:$4 sm:$0xff]  }
  0x35   : > { %1698 = vmatpush1.bf16.msra.mxu1 %v4672_v27  ;;  %1658 = vmatprep.subr.bf16.mxu0 %v4673_v28  ;;  %v4709_v56 = vld [vmem:[%s6902_s2 + $0x144] ss:$16 sps:$4 sm:$0xff]   ;;  %v4713_v58 = vld [vmem:[%s6902_s2 + $0x140] ss:$16 sps:$4 sm:$0xff]   ;;  %v4759_v28 = vld [vmem:[%s6902_s2 + $0x88] ss:$16 sps:$4 sm:$0xff]  }
  0x36   : > { %1699 = vmatprep.subr.bf16.mxu1 %v4675_v29  ;;  %1676 = vmatprep.mubr.bf16.mxu0 %v5609_v49  ;;  %v4711_v57 = vld [vmem:[%s6902_s2 + $0x344] ss:$16 sps:$4 sm:$0xff]   ;;  %v4714_v59 = vld [vmem:[%s6902_s2 + $0x340] ss:$16 sps:$4 sm:$0xff]  }
  0x37   : > { %v4715_v60 = vld [vmem:[%s6902_s2 + $0x124] ss:$16 sps:$4 sm:$0xff]   ;;  %v4719_v62 = vld [vmem:[%s6902_s2 + $0x120] ss:$16 sps:$4 sm:$0xff]  }
  0x38   : > { %1659 = vmatpush1.bf16.msra.mxu0 %v4677_v30  ;;  %v4717_v61 = vld [vmem:[%s6902_s2 + $0x324] ss:$16 sps:$4 sm:$0xff]   ;;  %v4720_v63 = vld [vmem:[%s6902_s2 + $0x320] ss:$16 sps:$4 sm:$0xff]   ;;  %v4767_v30 = vld [vmem:[%s6902_s2 + $0x6c] ss:$16 sps:$4 sm:$0xff]  }
  0x39   : > { %1700 = vmatpush1.bf16.msra.mxu1 %v4678_v31  ;;  %1660 = vmatprep.subr.bf16.mxu0 %v4679_v32  ;;  %v4721_v0 = vld [vmem:[%s6902_s2 + $0x104] ss:$16 sps:$4 sm:$0xff]   ;;  %v4725_v2 = vld [vmem:[%s6902_s2 + $0x100] ss:$16 sps:$4 sm:$0xff]  }
  0x3a   : > { %1701 = vmatprep.subr.bf16.mxu1 %v4681_v33  ;;  %v4723_v1 = vld [vmem:[%s6902_s2 + $0x304] ss:$16 sps:$4 sm:$0xff]   ;;  %v4726_v3 = vld [vmem:[%s6902_s2 + $0x300] ss:$16 sps:$4 sm:$0xff]  }
  0x3b   : > { %v4734_v4 = vld [vmem:[%s6902_s2 + $0x4e4] ss:$16 sps:$4 sm:$0xff]   ;;  %v4732_v8 = vld [vmem:[%s6902_s2 + $0x4e0] ss:$16 sps:$4 sm:$0xff]  }
  0x3c   : > { %1661 = vmatpush2.bf16.msra.mxu0 %v4683_v34  ;;  %v4737_v5 = vld [vmem:[%s6902_s2 + $0x604] ss:$16 sps:$4 sm:$0xff]   ;;  %v4735_v9 = vld [vmem:[%s6902_s2 + $0x600] ss:$16 sps:$4 sm:$0xff]   ;;  %v4765_v34 = vld [vmem:[%s6902_s2 + $0x68] ss:$16 sps:$4 sm:$0xff]  }
  0x3d   : > { %1702 = vmatpush2.bf16.msra.mxu1 %v4684_v35  ;;  %1662 = vmatprep.subr.bf16.mxu0 %v4685_v36  ;;  %v4740_v10 = vld [vmem:[%s6902_s2 + $0x4c4] ss:$16 sps:$4 sm:$0xff]   ;;  %v4738_v12 = vld [vmem:[%s6902_s2 + $0x4c0] ss:$16 sps:$4 sm:$0xff]   ;;  %v4773_v36 = vld [vmem:[%s6902_s2 + $0x4c] ss:$16 sps:$4 sm:$0xff]  }
  0x3e   : > { %1703 = vmatprep.subr.bf16.mxu1 %v4687_v37  ;;  %v4746_v14 = vld [vmem:[%s6902_s2 + $0x4a4] ss:$16 sps:$4 sm:$0xff]   ;;  %v4744_v17 = vld [vmem:[%s6902_s2 + $0x4a0] ss:$16 sps:$4 sm:$0xff]  }
  0x3f   : > { %v4752_v19 = vld [vmem:[%s6902_s2 + $0x484] ss:$16 sps:$4 sm:$0xff]   ;;  %v4750_v21 = vld [vmem:[%s6902_s2 + $0x480] ss:$16 sps:$4 sm:$0xff]  }
  0x40   : > { %1663 = vmatpush2.bf16.msra.mxu0 %v4689_v38  ;;  %v4758_v23 = vld [vmem:[%s6902_s2 + $0x464] ss:$16 sps:$4 sm:$0xff]   ;;  %v4756_v25 = vld [vmem:[%s6902_s2 + $0x460] ss:$16 sps:$4 sm:$0xff]   ;;  %v4771_v38 = vld [vmem:[%s6902_s2 + $0x48] ss:$16 sps:$4 sm:$0xff]  }
  0x41   : > { %1704 = vmatpush2.bf16.msra.mxu1 %v4690_v39  ;;  %1664 = vmatprep.subr.bf16.mxu0 %v4691_v40  ;;  %v4764_v27 = vld [vmem:[%s6902_s2 + $0x444] ss:$16 sps:$4 sm:$0xff]   ;;  %v4762_v29 = vld [vmem:[%s6902_s2 + $0x440] ss:$16 sps:$4 sm:$0xff]   ;;  %v4779_v40 = vld [vmem:[%s6902_s2 + $0x2c] ss:$16 sps:$4 sm:$0xff]  }
  0x42   : > { %1705 = vmatprep.subr.bf16.mxu1 %v4693_v41  ;;  %v4770_v31 = vld [vmem:[%s6902_s2 + $0x424] ss:$16 sps:$4 sm:$0xff]   ;;  %v4768_v35 = vld [vmem:[%s6902_s2 + $0x420] ss:$16 sps:$4 sm:$0xff]  }
  0x43   : > { %v5747_v32 = vld [vmem:[%s5594_s23 + $0x10] sm:$0xff] }
  0x44   : > { %1665 = vmatpush2.bf16.msra.mxu0 %v4695_v42  ;;  %v5751_v33 = vcombine.high %v5747_v32, %v5747_v32  ;;  %v4776_v37 = vld [vmem:[%s6902_s2 + $0x404] ss:$16 sps:$4 sm:$0xff]   ;;  %v4774_v39 = vld [vmem:[%s6902_s2 + $0x400] ss:$16 sps:$4 sm:$0xff]   ;;  %v4777_v42 = vld [vmem:[%s6902_s2 + $0x28] ss:$16 sps:$4 sm:$0xff]  }
  0x45   : > { %1706 = vmatpush2.bf16.msra.mxu1 %v4696_v43  ;;  %1666 = vmatprep.subr.bf16.mxu0 %v4697_v44  ;;  %v4782_v41 = vld [vmem:[%s6902_s2 + $0x5e4] ss:$16 sps:$4 sm:$0xff]   ;;  %v4780_v43 = vld [vmem:[%s6902_s2 + $0x5e0] ss:$16 sps:$4 sm:$0xff]   ;;  %v4785_v44 = vld [vmem:[%s6902_s2 + $0xc] ss:$16 sps:$4 sm:$0xff]  }
  0x46   : > { %1707 = vmatprep.subr.bf16.mxu1 %v4699_v45  ;;  %v4788_v45 = vld [vmem:[%s6902_s2 + $0x5c4] ss:$16 sps:$4 sm:$0xff]   ;;  %v4786_v47 = vld [vmem:[%s6902_s2 + $0x5c0] ss:$16 sps:$4 sm:$0xff]  }
  0x48   : > { %1667 = vmatpush2.bf16.msra.mxu0 %v4701_v46  ;;  %v4783_v46 = vld [vmem:[%s6902_s2 + $0x8] ss:$16 sps:$4 sm:$0xff]  }
  0x49   : > { %1708 = vmatpush2.bf16.msra.mxu1 %v4702_v48  ;;  %1668 = vmatprep.subr.bf16.mxu0 %v4703_v51  ;;  %v4791_v48 = vld [vmem:[%s6902_s2 + $0x1ec] ss:$16 sps:$4 sm:$0xff]   ;;  %v4792_v51 = vld [vmem:[%s6902_s2 + $0x5a0] ss:$16 sps:$4 sm:$0xff]  }
  0x4a   : > { %1709 = vmatprep.subr.bf16.mxu1 %v4705_v53  ;;  %v4797_v53 = vld [vmem:[%s6902_s2 + $0x1cc] ss:$16 sps:$4 sm:$0xff]  }
  0x4c   : > { %1669 = vmatpush2.bf16.msra.mxu0 %v4707_v54  ;;  %v4800_v54 = vld [vmem:[%s6902_s2 + $0x584] ss:$16 sps:$4 sm:$0xff]  }
  0x4d   : > { %1710 = vmatpush2.bf16.msra.mxu1 %v4708_v55  ;;  %1670 = vmatprep.subr.bf16.mxu0 %v4709_v56  ;;  %v4795_v55 = vld [vmem:[%s6902_s2 + $0x1c8] ss:$16 sps:$4 sm:$0xff]   ;;  %v4798_v56 = vld [vmem:[%s6902_s2 + $0x580] ss:$16 sps:$4 sm:$0xff]  }
  0x4e   : > { %1711 = vmatprep.subr.bf16.mxu1 %v4711_v57  ;;  %v4803_v57 = vld [vmem:[%s6902_s2 + $0x1ac] ss:$16 sps:$4 sm:$0xff]  }
  0x50   : > { %1671 = vmatpush2.bf16.msra.mxu0 %v4713_v58  ;;  %v4806_v58 = vld [vmem:[%s6902_s2 + $0x564] ss:$16 sps:$4 sm:$0xff]  }
  0x51   : > { %1712 = vmatpush2.bf16.msra.mxu1 %v4714_v59  ;;  %1672 = vmatprep.subr.bf16.mxu0 %v4715_v60  ;;  %v4801_v59 = vld [vmem:[%s6902_s2 + $0x1a8] ss:$16 sps:$4 sm:$0xff]   ;;  %v4804_v60 = vld [vmem:[%s6902_s2 + $0x560] ss:$16 sps:$4 sm:$0xff]  }
  0x52   : > { %1713 = vmatprep.subr.bf16.mxu1 %v4717_v61  ;;  %v4809_v61 = vld [vmem:[%s6902_s2 + $0x18c] ss:$16 sps:$4 sm:$0xff]  }
  0x54   : > { %1673 = vmatpush2.bf16.msra.mxu0 %v4719_v62  ;;  %v4812_v62 = vld [vmem:[%s6902_s2 + $0x544] ss:$16 sps:$4 sm:$0xff]  }
  0x55   : > { %1714 = vmatpush2.bf16.msra.mxu1 %v4720_v63  ;;  %1674 = vmatprep.subr.bf16.mxu0 %v4721_v0  ;;  %v4807_v63 = vld [vmem:[%s6902_s2 + $0x188] ss:$16 sps:$4 sm:$0xff]   ;;  %v4810_v0 = vld [vmem:[%s6902_s2 + $0x540] ss:$16 sps:$4 sm:$0xff]  }
  0x56   : > { %1715 = vmatprep.subr.bf16.mxu1 %v4723_v1  ;;  %v4815_v1 = vld [vmem:[%s6902_s2 + $0x16c] ss:$16 sps:$4 sm:$0xff]  }
  0x58   : > { %1675 = vmatpush2.bf16.msra.mxu0 %v4725_v2  ;;  %v4818_v2 = vld [vmem:[%s6902_s2 + $0x524] ss:$16 sps:$4 sm:$0xff]  }
  0x59   : > { %1716 = vmatpush2.bf16.msra.mxu1 %v4726_v3  ;;  %1726 = vmatprep.subr.bf16.mxu0 %v4734_v4  ;;  %v4813_v3 = vld [vmem:[%s6902_s2 + $0x168] ss:$16 sps:$4 sm:$0xff]   ;;  %v4816_v4 = vld [vmem:[%s6902_s2 + $0x520] ss:$16 sps:$4 sm:$0xff]  }
  0x5a   : > { %1781 = vmatprep.subr.bf16.mxu1 %v4737_v5  ;;  %v4821_v5 = vld [vmem:[%s6902_s2 + $0x14c] ss:$16 sps:$4 sm:$0xff]  }
  0x5b   : > { %1677 = vmatmul.mubr.bf16.vlgmr.msra.gmra.mxu0 %v5670_v6 }
  0x5c   : > { %1718 = vmatmul.mubr.bf16.vlgmr.msra.gmra.mxu1 %v5672_v7  ;;  %1727 = vmatpush1.bf16.msra.mxu0 %v4732_v8  ;;  %v4824_v8 = vld [vmem:[%s6902_s2 + $0x504] ss:$16 sps:$4 sm:$0xff]  }
  0x5d   : > { %1782 = vmatpush1.bf16.msra.mxu1 %v4735_v9  ;;  %1728 = vmatprep.subr.bf16.mxu0 %v4740_v10  ;;  %v4819_v9 = vld [vmem:[%s6902_s2 + $0x148] ss:$16 sps:$4 sm:$0xff]   ;;  %v4822_v10 = vld [vmem:[%s6902_s2 + $0x500] ss:$16 sps:$4 sm:$0xff]  }
  0x5e   : > { %1799 = vmatprep.mubr.bf16.mxu1 %v5342_v13  ;;  %1808 = vmatprep.subr.bf16.mxu1 %v4743_v11  ;;  %v4829_v11 = vld [vmem:[%s6902_s2 + $0x12c] ss:$16 sps:$4 sm:$0xff]  }
  0x5f   : > { %1758 = vmatprep.mubr.bf16.mxu0 %v5751_v33 }
  0x60   : > { %1729 = vmatpush1.bf16.msra.mxu0 %v4738_v12  ;;  %v4832_v12 = vld [vmem:[%s6902_s2 + $0x2ec] ss:$16 sps:$4 sm:$0xff]  }
  0x61   : > { %1730 = vmatprep.subr.bf16.mxu0 %v4746_v14  ;;  %v5876_v14 = vcombine.low %v5747_v32, %v5747_v32  ;;  %v4862_v32 = vld [vmem:[%s6902_s2 + $0x24c] ss:$16 sps:$4 sm:$0xff]  }
  0x64   : > { %4308 = vmatmul.mubr.msk.bf16.vlgmr.msra.gmra.mxu1 %vm1640_vm0, %v4729_v15  ;;  %1731 = vmatpush1.bf16.msra.mxu0 %v4744_v17  ;;  %v4827_v15 = vld [vmem:[%s6902_s2 + $0x128] ss:$16 sps:$4 sm:$0xff]   ;;  %v4835_v17 = vld [vmem:[%s6902_s2 + $0x10c] ss:$16 sps:$4 sm:$0xff]  }
  0x65   : > { %1809 = vmatpush1.bf16.msra.mxu1 %v4741_v16  ;;  %1732 = vmatprep.subr.bf16.mxu0 %v4752_v19  ;;  %v4830_v16 = vld [vmem:[%s6902_s2 + $0x2e8] ss:$16 sps:$4 sm:$0xff]  }
  0x66   : > { %1810 = vmatprep.subr.bf16.mxu1 %v4749_v18  ;;  %1840 = vmatprep.mubr.bf16.mxu1 %v5609_v49  ;;  %v4794_v49 = vld [vmem:[%s6902_s2 + $0x5a4] ss:$16 sps:$4 sm:$0xff]   ;;  %v4838_v18 = vld [vmem:[%s6902_s2 + $0x2cc] ss:$16 sps:$4 sm:$0xff]   ;;  %v4833_v19 = vld [vmem:[%s6902_s2 + $0x108] ss:$16 sps:$4 sm:$0xff]  }
  0x68   : > { %1733 = vmatpush1.bf16.msra.mxu0 %v4750_v21  ;;  %v4841_v21 = vld [vmem:[%s6902_s2 + $0x4ec] ss:$16 sps:$4 sm:$0xff]  }
  0x69   : > { %1811 = vmatpush1.bf16.msra.mxu1 %v4747_v20  ;;  %1734 = vmatprep.subr.bf16.mxu0 %v4758_v23  ;;  %v4836_v20 = vld [vmem:[%s6902_s2 + $0x2c8] ss:$16 sps:$4 sm:$0xff]  }
  0x6a   : > { %1812 = vmatprep.subr.bf16.mxu1 %v4755_v22  ;;  %v4844_v22 = vld [vmem:[%s6902_s2 + $0x2ac] ss:$16 sps:$4 sm:$0xff]   ;;  %v4839_v23 = vld [vmem:[%s6902_s2 + $0x4e8] ss:$16 sps:$4 sm:$0xff]  }
  0x6c   : > { %1735 = vmatpush1.bf16.msra.mxu0 %v4756_v25  ;;  %v4847_v25 = vld [vmem:[%s6902_s2 + $0x4cc] ss:$16 sps:$4 sm:$0xff]  }
  0x6d   : > { %1813 = vmatpush1.bf16.msra.mxu1 %v4753_v24  ;;  %1736 = vmatprep.subr.bf16.mxu0 %v4764_v27  ;;  %v4842_v24 = vld [vmem:[%s6902_s2 + $0x2a8] ss:$16 sps:$4 sm:$0xff]  }
  0x6e   : > { %1814 = vmatprep.subr.bf16.mxu1 %v4761_v26  ;;  %v4850_v26 = vld [vmem:[%s6902_s2 + $0x28c] ss:$16 sps:$4 sm:$0xff]   ;;  %v4845_v27 = vld [vmem:[%s6902_s2 + $0x4c8] ss:$16 sps:$4 sm:$0xff]  }
  0x70   : > { %1737 = vmatpush1.bf16.msra.mxu0 %v4762_v29  ;;  %v4856_v29 = vld [vmem:[%s6902_s2 + $0x26c] ss:$16 sps:$4 sm:$0xff]  }
  0x71   : > { %1815 = vmatpush1.bf16.msra.mxu1 %v4759_v28  ;;  %1738 = vmatprep.subr.bf16.mxu0 %v4770_v31  ;;  %v4853_v28 = vld [vmem:[%s6902_s2 + $0x4ac] ss:$16 sps:$4 sm:$0xff]  }
  0x72   : > { %1816 = vmatprep.subr.bf16.mxu1 %v4767_v30  ;;  %v4851_v30 = vld [vmem:[%s6902_s2 + $0x4a8] ss:$16 sps:$4 sm:$0xff]   ;;  %v4859_v31 = vld [vmem:[%s6902_s2 + $0x48c] ss:$16 sps:$4 sm:$0xff]  }
  0x74   : > { %1739 = vmatpush1.bf16.msra.mxu0 %v4768_v35  ;;  %v4865_v35 = vld [vmem:[%s6902_s2 + $0x46c] ss:$16 sps:$4 sm:$0xff]  }
  0x75   : > { %1817 = vmatpush1.bf16.msra.mxu1 %v4765_v34  ;;  %1740 = vmatprep.subr.bf16.mxu0 %v4776_v37  ;;  %v4857_v34 = vld [vmem:[%s6902_s2 + $0x488] ss:$16 sps:$4 sm:$0xff]  }
  0x76   : > { %1818 = vmatprep.subr.bf16.mxu1 %v4773_v36  ;;  %v4868_v36 = vld [vmem:[%s6902_s2 + $0x22c] ss:$16 sps:$4 sm:$0xff]   ;;  %v4863_v37 = vld [vmem:[%s6902_s2 + $0x468] ss:$16 sps:$4 sm:$0xff]  }
  0x78   : > { %1741 = vmatpush1.bf16.msra.mxu0 %v4774_v39  ;;  %v4871_v39 = vld [vmem:[%s6902_s2 + $0x44c] ss:$16 sps:$4 sm:$0xff]  }
  0x79   : > { %1819 = vmatpush1.bf16.msra.mxu1 %v4771_v38  ;;  %1742 = vmatprep.subr.bf16.mxu0 %v4782_v41  ;;  %v4866_v38 = vld [vmem:[%s6902_s2 + $0x228] ss:$16 sps:$4 sm:$0xff]  }
  0x7a   : > { %1820 = vmatprep.subr.bf16.mxu1 %v4779_v40  ;;  %v4874_v40 = vld [vmem:[%s6902_s2 + $0x20c] ss:$16 sps:$4 sm:$0xff]   ;;  %v4869_v41 = vld [vmem:[%s6902_s2 + $0x448] ss:$16 sps:$4 sm:$0xff]  }
  0x7c   : > { %1743 = vmatpush2.bf16.msra.mxu0 %v4780_v43  ;;  %v4877_v43 = vld [vmem:[%s6902_s2 + $0x42c] ss:$16 sps:$4 sm:$0xff]  }
  0x7d   : > { %1821 = vmatpush1.bf16.msra.mxu1 %v4777_v42  ;;  %1744 = vmatprep.subr.bf16.mxu0 %v4788_v45  ;;  %v4872_v42 = vld [vmem:[%s6902_s2 + $0x208] ss:$16 sps:$4 sm:$0xff]  }
  0x7e   : > { %1822 = vmatprep.subr.bf16.mxu1 %v4785_v44  ;;  %v4880_v44 = vld [vmem:[%s6902_s2 + $0x3ec] ss:$16 sps:$4 sm:$0xff]   ;;  %v4875_v45 = vld [vmem:[%s6902_s2 + $0x428] ss:$16 sps:$4 sm:$0xff]  }
  0x80   : > { %1745 = vmatpush2.bf16.msra.mxu0 %v4786_v47  ;;  %v4883_v47 = vld [vmem:[%s6902_s2 + $0x40c] ss:$16 sps:$4 sm:$0xff]  }
  0x81   : > { %1823 = vmatpush1.bf16.msra.mxu1 %v4783_v46  ;;  %1746 = vmatprep.subr.bf16.mxu0 %v4794_v49  ;;  %v4878_v46 = vld [vmem:[%s6902_s2 + $0x3e8] ss:$16 sps:$4 sm:$0xff]  }
  0x82   : > { %1824 = vmatprep.subr.bf16.mxu1 %v4791_v48  ;;  %v4886_v48 = vld [vmem:[%s6902_s2 + $0x3cc] ss:$16 sps:$4 sm:$0xff]   ;;  %v4881_v49 = vld [vmem:[%s6902_s2 + $0x408] ss:$16 sps:$4 sm:$0xff]  }
  0x84   : > { %1747 = vmatpush2.bf16.msra.mxu0 %v4792_v51  ;;  %v4889_v51 = vld [vmem:[%s6902_s2 + $0x5ec] ss:$16 sps:$4 sm:$0xff]  }
  0x85   : > { %1825 = vmatpush2.bf16.msra.mxu1 %v4789_v50  ;;  %1748 = vmatprep.subr.bf16.mxu0 %v4800_v54  ;;  %v4884_v50 = vld [vmem:[%s6902_s2 + $0x3c8] ss:$16 sps:$4 sm:$0xff]  }
  0x86   : > { %1826 = vmatprep.subr.bf16.mxu1 %v4797_v53  ;;  %v4892_v53 = vld [vmem:[%s6902_s2 + $0x3ac] ss:$16 sps:$4 sm:$0xff]   ;;  %v4887_v54 = vld [vmem:[%s6902_s2 + $0x5e8] ss:$16 sps:$4 sm:$0xff]  }
  0x88   : > { %1749 = vmatpush2.bf16.msra.mxu0 %v4798_v56  ;;  %v4895_v56 = vld [vmem:[%s6902_s2 + $0x5cc] ss:$16 sps:$4 sm:$0xff]  }
  0x89   : > { %1827 = vmatpush2.bf16.msra.mxu1 %v4795_v55  ;;  %1750 = vmatprep.subr.bf16.mxu0 %v4806_v58  ;;  %v4890_v55 = vld [vmem:[%s6902_s2 + $0x3a8] ss:$16 sps:$4 sm:$0xff]  }
  0x8a   : > { %1828 = vmatprep.subr.bf16.mxu1 %v4803_v57  ;;  %v4898_v57 = vld [vmem:[%s6902_s2 + $0x38c] ss:$16 sps:$4 sm:$0xff]   ;;  %v4893_v58 = vld [vmem:[%s6902_s2 + $0x5c8] ss:$16 sps:$4 sm:$0xff]  }
  0x8c   : > { %1751 = vmatpush2.bf16.msra.mxu0 %v4804_v60  ;;  %v4901_v60 = vld [vmem:[%s6902_s2 + $0x5ac] ss:$16 sps:$4 sm:$0xff]  }
  0x8d   : > { %1829 = vmatpush2.bf16.msra.mxu1 %v4801_v59  ;;  %1752 = vmatprep.subr.bf16.mxu0 %v4812_v62  ;;  %v4896_v59 = vld [vmem:[%s6902_s2 + $0x388] ss:$16 sps:$4 sm:$0xff]  }
  0x8e   : > { %1830 = vmatprep.subr.bf16.mxu1 %v4809_v61  ;;  %v4904_v61 = vld [vmem:[%s6902_s2 + $0x36c] ss:$16 sps:$4 sm:$0xff]   ;;  %v4899_v62 = vld [vmem:[%s6902_s2 + $0x5a8] ss:$16 sps:$4 sm:$0xff]  }
  0x90   : > { %1753 = vmatpush2.bf16.msra.mxu0 %v4810_v0  ;;  %v4907_v0 = vld [vmem:[%s6902_s2 + $0x58c] ss:$16 sps:$4 sm:$0xff]  }
  0x91   : > { %1831 = vmatpush2.bf16.msra.mxu1 %v4807_v63  ;;  %1754 = vmatprep.subr.bf16.mxu0 %v4818_v2  ;;  %v4902_v63 = vld [vmem:[%s6902_s2 + $0x368] ss:$16 sps:$4 sm:$0xff]  }
  0x92   : > { %1832 = vmatprep.subr.bf16.mxu1 %v4815_v1  ;;  %v4910_v1 = vld [vmem:[%s6902_s2 + $0x34c] ss:$16 sps:$4 sm:$0xff]   ;;  %v4905_v2 = vld [vmem:[%s6902_s2 + $0x588] ss:$16 sps:$4 sm:$0xff]  }
  0x94   : > { %1755 = vmatpush2.bf16.msra.mxu0 %v4816_v4  ;;  %v4913_v4 = vld [vmem:[%s6902_s2 + $0x56c] ss:$16 sps:$4 sm:$0xff]  }
  0x95   : > { %1833 = vmatpush2.bf16.msra.mxu1 %v4813_v3  ;;  %1756 = vmatprep.subr.bf16.mxu0 %v4824_v8  ;;  %v4908_v3 = vld [vmem:[%s6902_s2 + $0x348] ss:$16 sps:$4 sm:$0xff]  }
  0x96   : > { %1834 = vmatprep.subr.bf16.mxu1 %v4821_v5  ;;  %v4916_v5 = vld [vmem:[%s6902_s2 + $0x32c] ss:$16 sps:$4 sm:$0xff]   ;;  %v4911_v8 = vld [vmem:[%s6902_s2 + $0x568] ss:$16 sps:$4 sm:$0xff]  }
  0x98   : > { %1757 = vmatpush2.bf16.msra.mxu0 %v4822_v10  ;;  %v4919_v10 = vld [vmem:[%s6902_s2 + $0x54c] ss:$16 sps:$4 sm:$0xff]  }
  0x99   : > { %1835 = vmatpush2.bf16.msra.mxu1 %v4819_v9  ;;  %1849 = vmatprep.subr.bf16.mxu0 %v4832_v12  ;;  %v4914_v9 = vld [vmem:[%s6902_s2 + $0x328] ss:$16 sps:$4 sm:$0xff]  }
  0x9a   : > { %1836 = vmatprep.subr.bf16.mxu1 %v4829_v11  ;;  %v4922_v11 = vld [vmem:[%s6902_s2 + $0x30c] ss:$16 sps:$4 sm:$0xff]   ;;  %v4917_v12 = vld [vmem:[%s6902_s2 + $0x548] ss:$16 sps:$4 sm:$0xff]  }
  0x9b   : > { %1759 = vmatmul.mubr.bf16.vlgmr.msra.gmra.mxu0 %v5876_v14 }
  0x9c   : > { %1850 = vmatpush1.bf16.msra.mxu0 %v4830_v16  ;;  %1881 = vmatprep.mubr.bf16.mxu0 %v5615_v52  ;;  %v4848_v52 = vld [vmem:[%s6902_s2 + $0x288] ss:$16 sps:$4 sm:$0xff]   ;;  %v4925_v16 = vld [vmem:[%s6902_s2 + $0x52c] ss:$16 sps:$4 sm:$0xff]  }
  0x9d   : > { %1837 = vmatpush2.bf16.msra.mxu1 %v4827_v15  ;;  %1851 = vmatprep.subr.bf16.mxu0 %v4838_v18  ;;  %v4920_v15 = vld [vmem:[%s6902_s2 + $0x308] ss:$16 sps:$4 sm:$0xff]  }
  0x9e   : > { %1838 = vmatprep.subr.bf16.mxu1 %v4835_v17  ;;  %v4932_v17 = vld [vmem:[%s6904_s4 + $0x78] sm:$0xff]  }
  0x9f   : > { %v4923_v18 = vld [vmem:[%s6902_s2 + $0x528] ss:$16 sps:$4 sm:$0xff]  }
  0xa0   : > { %1852 = vmatpush1.bf16.msra.mxu0 %v4836_v20  ;;  %v4928_v20 = vld [vmem:[%s6902_s2 + $0x50c] ss:$16 sps:$4 sm:$0xff]  }
  0xa1   : > { %1839 = vmatpush2.bf16.msra.mxu1 %v4833_v19  ;;  %1853 = vmatprep.subr.bf16.mxu0 %v4844_v22  ;;  %v4933_v19 = vld [vmem:[%s6904_s4 + $0x38] sm:$0xff]  }
  0xa2   : > { %1890 = vmatprep.subr.bf16.mxu1 %v4841_v21  ;;  %v4934_v21 = vld [vmem:[%s6904_s4 + $0x70] sm:$0xff]   ;;  %v4926_v22 = vld [vmem:[%s6902_s2 + $0x508] ss:$16 sps:$4 sm:$0xff]  }
  0xa4   : > { %1841 = vmatmul.mubr.bf16.vlgmr.msra.gmra.mxu1 %v5670_v6  ;;  %1854 = vmatpush1.bf16.msra.mxu0 %v4842_v24  ;;  %v4854_v6 = vld [vmem:[%s6902_s2 + $0x268] ss:$16 sps:$4 sm:$0xff]   ;;  %v4931_v24 = vld [vmem:[%s6902_s2 + $0x60c] ss:$16 sps:$4 sm:$0xff]  }
  0xa5   : > { %1891 = vmatpush1.bf16.msra.mxu1 %v4839_v23  ;;  %1855 = vmatprep.subr.bf16.mxu0 %v4850_v26  ;;  %v4935_v23 = vld [vmem:[%s6904_s4 + $0x30] sm:$0xff]   ;;  %v4929_v26 = vld [vmem:[%s6902_s2 + $0x608] ss:$16 sps:$4 sm:$0xff]  }
  0xa6   : > { %1892 = vmatprep.subr.bf16.mxu1 %v4847_v25  ;;  %1922 = vmatprep.mubr.bf16.mxu1 %v5751_v33  ;;  %v4860_v33 = vld [vmem:[%s6902_s2 + $0x248] ss:$16 sps:$4 sm:$0xff]  }
  0xa7   : > { %v4936_v25 = vld [vmem:[%s6904_s4 + $0x68] sm:$0xff]  }
  0xa8   : > { %1856 = vmatpush1.bf16.msra.mxu0 %v4848_v52  ;;  %v4939_v52 = vld [vmem:[%s6904_s4 + $0x20] sm:$0xff]  }
  0xa9   : > { %1893 = vmatpush1.bf16.msra.mxu1 %v4845_v27  ;;  %1857 = vmatprep.subr.bf16.mxu0 %v4856_v29  ;;  %v4938_v27 = vld [vmem:[%s6904_s4 + $0x60] sm:$0xff]   ;;  %v4942_v29 = vld [vmem:[%s6904_s4 + $0x50] sm:$0xff]  }
  0xaa   : > { %1894 = vmatprep.subr.bf16.mxu1 %v4853_v28  ;;  %v4940_v28 = vld [vmem:[%s6904_s4 + $0x58] sm:$0xff]  }
  0xac   : > { %1858 = vmatpush1.bf16.msra.mxu0 %v4854_v6  ;;  %v4949_v6 = vld [vmem:[%s6904_s4 + $0xb0] sm:$0xff]  }
  0xad   : > { %1895 = vmatpush1.bf16.msra.mxu1 %v4851_v30  ;;  %1859 = vmatprep.subr.bf16.mxu0 %v4862_v32  ;;  %v4948_v30 = vld [vmem:[%s6904_s4 + $0xb8] sm:$0xff]   ;;  %v4943_v32 = vld [vmem:[%s6904_s4 + $0x10] sm:$0xff]  }
  0xae   : > { %1896 = vmatprep.subr.bf16.mxu1 %v4859_v31  ;;  %v5249_v31 = vld [vmem:[%s5594_s23 + $0x18] ss:$0 sps:$4 sm:$0xff]   ;;  %s6205_s23 = sand.u32 1, %s5332_s18  }
  0xaf   : > { %s4102_s24 = sshll.u32 %s6205_s23, 3  ;;  %s3968_s30 = scalar_lea.sflag [#allocation5], %s6205_s23 }
  0xb0   : > { %1860 = vmatpush1.bf16.msra.mxu0 %v4860_v33  ;;  %v4950_v33 = vld [vmem:[%s6904_s4 + $0xa8] sm:$0xff]   ;;  %s6214_s29 = scalar_lea.vmem [#allocation4], %s4102_s24 }
  0xb1   : > { %1897 = vmatpush1.bf16.msra.mxu1 %v4857_v34  ;;  %1861 = vmatprep.subr.bf16.mxu0 %v4868_v36  ;;  %v4944_v34 = vld [vmem:[%s6904_s4 + $0x48] sm:$0xff]   ;;  %v4946_v36 = vld [vmem:[%s6904_s4 + $0x40] sm:$0xff]   ;;  %s3995_s24 = sshll.u32 %s6214_s29, 4  ;;  %s3996_s24 = int_to_ptr.vmem [resolvable:$true] %s3995_s24 }
  0xb2   : > { %1898 = vmatprep.subr.bf16.mxu1 %v4865_v35  ;;  %v4945_v35 = vld [vmem:[%s6904_s4 + $0x8] sm:$0xff]   ;;  %s5250_s12 = scalar_lea.vmem %s3996_s24, 128  ;;  %p5257_p0 = scmp.lt.s32.totalorder %s3996_s24, %s5255_s13 }
  0xb3   : > { %p5251_p11 = scmp.ne.s32.totalorder %s3996_s24, %s5250_s12 }
  0xb4   : > { %1862 = vmatpush1.bf16.msra.mxu0 %v4866_v38 }
  0xb5   : > { %1899 = vmatpush1.bf16.msra.mxu1 %v4863_v37  ;;  %1863 = vmatprep.subr.bf16.mxu0 %v4874_v40  ;;  %v4947_v37 = vld [vmem:[%s6904_s4] sm:$0xff]   ;;  %p5252_p12 = pnand %p5251_p11, %p5444_p5 }
  0xb6   : > { %1900 = vmatprep.subr.bf16.mxu1 %v4871_v39  ;;  %v4951_v40 = vld [vmem:[%s6904_s4 + $0xa0] sm:$0xff]  }
  0xb7   : > { %p5253_p13 = pneg %p5252_p12 }
  0xb8   : > { %1864 = vmatpush1.bf16.msra.mxu0 %v4872_v42 }
  0xb9   : > { %1901 = vmatpush1.bf16.msra.mxu1 %v4869_v41  ;;  %1865 = vmatprep.subr.bf16.mxu0 %v4880_v44 }
  0xba   : > { %1902 = vmatprep.subr.bf16.mxu1 %v4877_v43  ;;  %v4952_v43 = vld [vmem:[%s6904_s4 + $0x98] sm:$0xff]  }
  0xbc   : > { %1866 = vmatpush2.bf16.msra.mxu0 %v4878_v46 }
  0xbd   : > { %1903 = vmatpush1.bf16.msra.mxu1 %v4875_v45  ;;  %1867 = vmatprep.subr.bf16.mxu0 %v4886_v48 }
  0xbe   : > { %1904 = vmatprep.subr.bf16.mxu1 %v4883_v47 }
  0xc0   : > { %1868 = vmatpush2.bf16.msra.mxu0 %v4884_v50 }
  0xc1   : > { %1905 = vmatpush1.bf16.msra.mxu1 %v4881_v49  ;;  %1869 = vmatprep.subr.bf16.mxu0 %v4892_v53  ;;  %v4953_v49 = vld [vmem:[%s6904_s4 + $0x90] sm:$0xff]   ;;  %v4954_v53 = vld [vmem:[%s6904_s4 + $0x88] sm:$0xff]  }
  0xc2   : > { %1906 = vmatprep.subr.bf16.mxu1 %v4889_v51 }
  0xc4   : > { %1870 = vmatpush2.bf16.msra.mxu0 %v4890_v55  ;;  %v4955_v55 = vld [vmem:[%s6904_s4 + $0x80] sm:$0xff]  }
  0xc5   : > { %1907 = vmatpush2.bf16.msra.mxu1 %v4887_v54  ;;  %1871 = vmatprep.subr.bf16.mxu0 %v4898_v57  ;;  %v616_v57 = vlaneseq }
  0xc6   : > { %1908 = vmatprep.subr.bf16.mxu1 %v4895_v56  ;;  %v4956_v56 = vld [vmem:[%s6904_s4 + $0xc0] sm:$0xff]  }
  0xc8   : > { %1872 = vmatpush2.bf16.msra.mxu0 %v4896_v59 }
  0xc9   : > { %1909 = vmatpush2.bf16.msra.mxu1 %v4893_v58  ;;  %1873 = vmatprep.subr.bf16.mxu0 %v4904_v61  ;;  %v6175_v58 = vshrl.u32 %v616_v57, 7 }
  0xca   : > { %1910 = vmatprep.subr.bf16.mxu1 %v4901_v60  ;;  %v614_v60 = vld [vmem:[%s6903_s3] sm:$0xf] }
  0xcb   : > { %v6178_v59 = vsub.s32 0, %v6175_v58  ;;  %v6184_v61 = vsub.s32 1, %v6175_v58 }
  0xcc   : > { %1874 = vmatpush2.bf16.msra.mxu0 %v4902_v63 }
  0xcd   : > { %1911 = vmatpush2.bf16.msra.mxu1 %v4899_v62  ;;  %1875 = vmatprep.subr.bf16.mxu0 %v4910_v1  ;;  %v619_v62 = vrot.slane %v614_v60, %v6178_v59  ;;  %v623_v63 = vrot.slane %v614_v60, %v6184_v61 }
  0xce   : > { %1912 = vmatprep.subr.bf16.mxu1 %v4907_v0 }
  0xd0   : > { %1876 = vmatpush2.bf16.msra.mxu0 %v4908_v3 }
  0xd1   : > { %1913 = vmatpush2.bf16.msra.mxu1 %v4905_v2  ;;  %1877 = vmatprep.subr.bf16.mxu0 %v4916_v5 }
  0xd2   : > { %1914 = vmatprep.subr.bf16.mxu1 %v4913_v4 }
  0xd4   : > { %1878 = vmatpush2.bf16.msra.mxu0 %v4914_v9 }
  0xd5   : > { %1915 = vmatpush2.bf16.msra.mxu1 %v4911_v8  ;;  %1879 = vmatprep.subr.bf16.mxu0 %v4922_v11 }
  0xd6   : > { %1916 = vmatprep.subr.bf16.mxu1 %v4919_v10 }
  0xd8   : > { %1880 = vmatpush2.bf16.msra.mxu0 %v4920_v15 }
  0xd9   : > { %1917 = vmatpush2.bf16.msra.mxu1 %v4917_v12  ;;  %4538 = vmatprep.subr.bf16.mxu0 %v4932_v17 }
  0xda   : > { %1918 = vmatprep.subr.bf16.mxu1 %v4925_v16 }
  0xdb   : > { %1882 = vmatmul.mubr.bf16.vlgmr.msra.gmra.mxu0 %v5672_v7  ;;  %v4937_v7 = vld [vmem:[%s6904_s4 + $0x28] sm:$0xff]  }
  0xdc   : > { %4539 = vmatpush3.bf16.msra.mxu0 %v4933_v19 }
  0xdd   : > { %1919 = vmatpush2.bf16.msra.mxu1 %v4923_v18  ;;  %4540 = vmatprep.subr.bf16.mxu0 %v4934_v21 }
  0xde   : > { %1920 = vmatprep.subr.bf16.mxu1 %v4928_v20 }
  0xe0   : > { %4541 = vmatpush3.bf16.msra.mxu0 %v4935_v23 }
  0xe1   : > { %1921 = vmatpush2.bf16.msra.mxu1 %v4926_v22  ;;  %4542 = vmatprep.subr.bf16.mxu0 %v4936_v25 }
  0xe2   : > { %1945 = vmatprep.subr.bf16.mxu1 %v4931_v24 }
  0xe4   : > { %1923 = vmatmul.mubr.bf16.vlgmr.msra.gmra.mxu1 %v5876_v14  ;;  %4543 = vmatpush3.bf16.msra.mxu0 %v4937_v7  ;;  %v4941_v14 = vld [vmem:[%s6904_s4 + $0x18] sm:$0xff]  }
  0xe5   : > { %1946 = vmatpush1.bf16.msra.mxu1 %v4929_v26  ;;  %1963 = vmatprep.mubr.bf16.mxu1 %v5342_v13  ;;  %v6189_v26 = vsub.s32 2, %v6175_v58 }
  0xe6   : > { %2230 = vmatprep.subr.bf16.mxu1 %v5342_v13  ;;  %4544 = vmatprep.subr.bf16.mxu0 %v4938_v27  ;;  %v6192_v27 = vsub.s32 3, %v6175_v58 }
  0xe8   : > { %4545 = vmatpush3.bf16.msra.mxu0 %v4939_v52 }
  0xe9   : > { %4546 = vmatprep.subr.bf16.mxu0 %v4940_v28  ;;  %v627_v28 = vrot.slane %v614_v60, %v6189_v26 }
  0xec   : > { %4309 = vmatmul.mubr.msk.bf16.vlgmr.msra.gmra.mxu1 %vm1640_vm0, %v5249_v31  ;;  %4547 = vmatpush3.bf16.msra.mxu0 %v4941_v14 }
  0xed   : > { %2231 = vmatpush1.bf16.msra.mxu1 %v4948_v30  ;;  %4548 = vmatprep.subr.bf16.mxu0 %v4942_v29  ;;  %v631_v29 = vrot.slane %v614_v60, %v6192_v27 }
  0xee   : > { %2232 = vmatprep.subr.bf16.mxu1 %v5342_v13 }
  0xf0   : > { %4549 = vmatpush3.bf16.msra.mxu0 %v4943_v32 }
  0xf1   : > { %2233 = vmatpush1.bf16.msra.mxu1 %v4949_v6  ;;  %4550 = vmatprep.subr.bf16.mxu0 %v4944_v34 }
  0xf2   : > { %2234 = vmatprep.subr.bf16.mxu1 %v5342_v13 }
  0xf4   : > { %4551 = vmatpush3.bf16.msra.mxu0 %v4945_v35 }
  0xf5   : > { %2235 = vmatpush1.bf16.msra.mxu1 %v4950_v33  ;;  %4552 = vmatprep.subr.bf16.mxu0 %v4946_v36 }
  0xf6   : > { %2236 = vmatprep.subr.bf16.mxu1 %v5342_v13 }
  0xf8   : > { %4553 = vmatpush3.bf16.msra.mxu0 %v4947_v37 }
  0xf9   : > { %2237 = vmatpush1.bf16.msra.mxu1 %v4951_v40 }
  0xfa   : > { %2238 = vmatprep.subr.bf16.mxu1 %v5342_v13 }
  0xfd   : > { %2239 = vmatpush1.bf16.msra.mxu1 %v4952_v43 }
  0xfe   : > { %2240 = vmatprep.subr.bf16.mxu1 %v5342_v13 }
 0x101   : > { %2241 = vmatpush1.bf16.msra.mxu1 %v4953_v49  ;;  %v4959_v49 = vld [vmem:[%s6906_s6 + $0x24] ss:$16 sps:$4 sm:$0xff]  }
 0x102   : > { %2242 = vmatprep.subr.bf16.mxu1 %v5342_v13 }
 0x105   : > { %2243 = vmatpush1.bf16.msra.mxu1 %v4954_v53 }
 0x106   : > { %2244 = vmatprep.subr.bf16.mxu1 %v5342_v13 }
 0x109   : > { %2245 = vmatpush1.bf16.msra.mxu1 %v4955_v55 }
 0x10a   : > { %2260 = vmatprep.subr.bf16.mxu1 %v5342_v13 }
 0x10d   : > { %2261 = vmatpush2.bf16.msra.mxu1 %v4956_v56  ;;  %v4310_v56 = vld [vmem:[%s6905_s5] ss:$0 sm:$0xff] }
 0x10e   : > { %2367 = vmatprep.subr.bf16.mxu1 %v4959_v49  ;;  %v5005_v49 = vld [vmem:[%s6908_s8 + $0x4d0] ss:$28 sps:$4 sm:$0xff]  }
 0x11b   : > { %v1678_v38 = vpop.f32.mrf.mxu0 }
 0x11c   : > { %v1719_v39 = vpop.f32.mrf.mxu1  ;;  %v1679_v0 = vadd.f32 %v1678_v38, %v619_v62 }
 0x11d   : > { %v1680_v41 = vpop.f32.mrf.mxu0 }
 0x11e   : > { %v1721_v42 = vpop.f32.mrf.mxu1  ;;  %v1681_v1 = vadd.f32 %v1680_v41, %v623_v63  ;;  %v1720_v2 = vadd.f32 %v1719_v39, %v1679_v0 }
 0x11f   : > { %v1682_v45 = vpop.f32.mrf.mxu0 }
 0x120   : > { %v1723_v44 = vpop.f32.mrf.mxu1  ;;  %v1722_v4 = vadd.f32 %v1721_v42, %v1681_v1 }
 0x121   : > { %v1683_v47 = vpop.f32.mrf.mxu0 }
 0x122   : > { %v1724_v46 = vpop.f32.mrf.mxu1 }
 0x124   : > { %v1801_v48 = vpop.f32.mrf.mxu1 }
 0x126   : > { %v1803_v50 = vpop.f32.mrf.mxu1 }
 0x128   : > { %v1805_v51 = vpop.f32.mrf.mxu1 }
 0x12a   : > { %v1806_v54 = vpop.f32.mrf.mxu1 }
 0x15b   : > { %v1760_v3 = vpop.f32.mrf.mxu0 }
 0x15c   : > { %v1761_v5 = vadd.f32 %v1760_v3, %v1720_v2 }
 0x15d   : > { %v1762_v8 = vpop.f32.mrf.mxu0 }
 0x15e   : > { %v1802_v9 = vadd.f32 %v1801_v48, %v1761_v5  ;;  %v1763_v10 = vadd.f32 %v1762_v8, %v1722_v4  ;;  %v4957_v48 = vld [vmem:[%s6906_s6 + $0x20] ss:$16 sps:$4 sm:$0xff]   ;;  %v4962_v4 = vld [vmem:[%s6906_s6 + $0x4] ss:$16 sps:$4 sm:$0xff]   ;;  %v4965_v8 = vld [vmem:[%s6906_s6 + $0x2c] ss:$16 sps:$4 sm:$0xff]  }
 0x15f   : > { %v1764_v11 = vpop.f32.mrf.mxu0  ;;  %v4960_v5 = vld [vmem:[%s6906_s6] ss:$16 sps:$4 sm:$0xff]  }
 0x160   : > { %v1804_v12 = vadd.f32 %v1803_v50, %v1763_v10  ;;  %v1972_v15 = vmax.f32 %v1802_v9, 0.0  ;;  %v4969_v10 = vld [vmem:[%s6908_s8 + $0x188] ss:$28 sps:$4 sm:$0xff]  }
 0x161   : > { %v1765_v16 = vpop.f32.mrf.mxu0  ;;  %v4971_v11 = vld [vmem:[%s6908_s8 + $0x18c] ss:$28 sps:$4 sm:$0xff]  }
 0x162   : > { %v1973_v17 = vmax.f32 %v1804_v12, 0.0  ;;  %v1976_v20 = vpack.c.bf16 %v1972_v15, %v1972_v15  ;;  %v4974_v12 = vld [vmem:[%s6908_s8 + $0x154] ss:$28 sps:$4 sm:$0xff]   ;;  %3585 = vmatprep.subr.bf16.mxu0 %v4971_v11  ;;  %v4977_v16 = vld [vmem:[%s6908_s8 + $0x11c] ss:$28 sps:$4 sm:$0xff]  }
 0x163   : > { %v4972_v15 = vld [vmem:[%s6908_s8 + $0x150] ss:$28 sps:$4 sm:$0xff]  }
 0x164   : > { %v1842_v18 = vpop.f32.mrf.mxu1  ;;  %v1977_v19 = vpack.c.bf16 %v1973_v17, %v1973_v17  ;;  %v4975_v17 = vld [vmem:[%s6908_s8 + $0x118] ss:$28 sps:$4 sm:$0xff]  }
 0x165   : > { %v1843_v6 = vadd.f32 %v1842_v18, %v627_v28  ;;  %v4980_v18 = vld [vmem:[%s6908_s8 + $0xe4] ss:$28 sps:$4 sm:$0xff]   ;;  %v4995_v28 = vld [vmem:[%s6908_s8 + $0x34c] ss:$28 sps:$4 sm:$0xff]   ;;  %v5052_v11 = vld [vmem:[%s6908_s8 + $0x194] ss:$28 sps:$4 sm:$0xff]  }
 0x166   : > { %v1844_v21 = vpop.f32.mrf.mxu1  ;;  %2222 = vmatprep.mubr.bf16.mxu0 %v1977_v19  ;;  %v4978_v19 = vld [vmem:[%s6908_s8 + $0xe0] ss:$28 sps:$4 sm:$0xff]  }
 0x167   : > { %2223 = vmatmul.mubr.bf16.vlgmr.msra.gmra.mxu0 %v1976_v20  ;;  %v1845_v32 = vadd.f32 %v1844_v21, %v631_v29  ;;  %v4983_v20 = vld [vmem:[%s6908_s8 + $0xac] ss:$28 sps:$4 sm:$0xff]   ;;  %v4998_v29 = vld [vmem:[%s6908_s8 + $0x314] ss:$28 sps:$4 sm:$0xff]  }
 0x168   : > { %v1846_v22 = vpop.f32.mrf.mxu1  ;;  %3586 = vmatpush1.bf16.msra.mxu0 %v4969_v10  ;;  %v4981_v21 = vld [vmem:[%s6908_s8 + $0xa8] ss:$28 sps:$4 sm:$0xff]   ;;  %v5044_v10 = vld [vmem:[%s6908_s8 + $0x540] ss:$28 sps:$4 sm:$0xff]  }
 0x169   : > { %3587 = vmatprep.subr.bf16.mxu0 %v4974_v12  ;;  %v4986_v22 = vld [vmem:[%s6908_s8 + $0x74] ss:$28 sps:$4 sm:$0xff]   ;;  %v2289_v12 = vld [vmem:[%s6907_s7] sm:$0xf] }
 0x16a   : > { %v1847_v23 = vpop.f32.mrf.mxu1 }
 0x16b   : > { %v4984_v23 = vld [vmem:[%s6908_s8 + $0x70] ss:$28 sps:$4 sm:$0xff]  }
 0x16c   : > { %3588 = vmatpush1.bf16.msra.mxu0 %v4972_v15  ;;  %v2294_v15 = vrot.slane %v2289_v12, %v6178_v59 }
 0x16d   : > { %3589 = vmatprep.subr.bf16.mxu0 %v4977_v16  ;;  %v2298_v16 = vrot.slane %v2289_v12, %v6184_v61 }
 0x170   : > { %3590 = vmatpush1.bf16.msra.mxu0 %v4975_v17 }
 0x171   : > { %3591 = vmatprep.subr.bf16.mxu0 %v4980_v18 }
 0x174   : > { %3592 = vmatpush1.bf16.msra.mxu0 %v4978_v19 }
 0x175   : > { %3593 = vmatprep.subr.bf16.mxu0 %v4983_v20 }
 0x178   : > { %3594 = vmatpush1.bf16.msra.mxu0 %v4981_v21 }
 0x179   : > { %3595 = vmatprep.subr.bf16.mxu0 %v4986_v22 }
 0x17c   : > { %3596 = vmatpush1.bf16.msra.mxu0 %v4984_v23 }
 0x19b   : > { %v1883_v24 = vpop.f32.mrf.mxu0 }
 0x19c   : > { %v1884_v34 = vadd.f32 %v1883_v24, %v1843_v6  ;;  %v4989_v24 = vld [vmem:[%s6908_s8 + $0x3c] ss:$28 sps:$4 sm:$0xff]  }
 0x19d   : > { %v1885_v25 = vpop.f32.mrf.mxu0  ;;  %3597 = vmatprep.subr.bf16.mxu0 %v4989_v24  ;;  %v5004_v6 = vld [vmem:[%s6908_s8 + $0x2dc] ss:$28 sps:$4 sm:$0xff]   ;;  %v2302_v24 = vrot.slane %v2289_v12, %v6189_v26 }
 0x19e   : > { %v1886_v35 = vadd.f32 %v1885_v25, %v1845_v32  ;;  %v4987_v25 = vld [vmem:[%s6908_s8 + $0x38] ss:$28 sps:$4 sm:$0xff]   ;;  %v5010_v32 = vld [vmem:[%s6908_s8 + $0x2a4] ss:$28 sps:$4 sm:$0xff]  }
 0x19f   : > { %v1887_v7 = vpop.f32.mrf.mxu0  ;;  %3598 = vmatpush1.bf16.msra.mxu0 %v4987_v25 }
 0x1a0   : > { %v4992_v7 = vld [vmem:[%s6908_s8 + $0x4] ss:$28 sps:$4 sm:$0xff]  }
 0x1a1   : > { %v1888_v52 = vpop.f32.mrf.mxu0  ;;  %3599 = vmatprep.subr.bf16.mxu0 %v4992_v7 }
 0x1a2   : > { %v4990_v52 = vld [vmem:[%s6908_s8] ss:$28 sps:$4 sm:$0xff]  }
 0x1a3   : > { %3600 = vmatpush1.bf16.msra.mxu0 %v4990_v52  ;;  %v5041_v52 = vld [vmem:[%s6908_s8 + $0x510] ss:$28 sps:$4 sm:$0xff]  }
 0x1a4   : > { %v1924_v14 = vpop.f32.mrf.mxu1  ;;  %3601 = vmatprep.subr.bf16.mxu0 %v4995_v28  ;;  %v2306_v28 = vrot.slane %v2289_v12, %v6192_v27  ;;  %v5095_v12 = vld [vmem:[%s6908_s8 + $0x198] ss:$28 sps:$4 sm:$0xff]  }
 0x1a5   : > { %v1925_v36 = vadd.f32 %v1924_v14, %v1884_v34  ;;  %v4993_v14 = vld [vmem:[%s6908_s8 + $0x348] ss:$28 sps:$4 sm:$0xff]   ;;  %v5008_v34 = vld [vmem:[%s6908_s8 + $0x2a0] ss:$28 sps:$4 sm:$0xff]  }
 0x1a6   : > { %v1926_v30 = vpop.f32.mrf.mxu1 }
 0x1a7   : > { %v1927_v38 = vadd.f32 %v1926_v30, %v1886_v35  ;;  %3602 = vmatpush2.bf16.msra.mxu0 %v4993_v14  ;;  %v4996_v30 = vld [vmem:[%s6908_s8 + $0x310] ss:$28 sps:$4 sm:$0xff]   ;;  %v5014_v35 = vld [vmem:[%s6908_s8 + $0x268] ss:$28 sps:$4 sm:$0xff]  }
 0x1a8   : > { %v1928_v31 = vpop.f32.mrf.mxu1  ;;  %3603 = vmatprep.subr.bf16.mxu0 %v4998_v29 }
 0x1a9   : > { %v5002_v31 = vld [vmem:[%s6908_s8 + $0x2d8] ss:$28 sps:$4 sm:$0xff]  }
 0x1aa   : > { %v1929_v33 = vpop.f32.mrf.mxu1 }
 0x1ab   : > { %3604 = vmatpush2.bf16.msra.mxu0 %v4996_v30  ;;  %v5016_v33 = vld [vmem:[%s6908_s8 + $0x26c] ss:$28 sps:$4 sm:$0xff]   ;;  %v5049_v30 = vld [vmem:[%s6908_s8 + $0x4dc] ss:$28 sps:$4 sm:$0xff]  }
 0x1ac   : > { %v1965_v37 = vpop.f32.mrf.mxu1  ;;  %3605 = vmatprep.subr.bf16.mxu0 %v5004_v6 }
 0x1ad   : > { %v1966_v39 = vadd.f32 %v1965_v37, %v1925_v36  ;;  %v5022_v36 = vld [vmem:[%s6908_s8 + $0x234] ss:$28 sps:$4 sm:$0xff]  }
 0x1ae   : > { %v1967_v40 = vpop.f32.mrf.mxu1  ;;  %v5020_v37 = vld [vmem:[%s6908_s8 + $0x230] ss:$28 sps:$4 sm:$0xff]  }
 0x1af   : > { %v1968_v41 = vadd.f32 %v1967_v40, %v1927_v38  ;;  %v1974_v42 = vmax.f32 %v1966_v39, 0.0  ;;  %3606 = vmatpush2.bf16.msra.mxu0 %v5002_v31 }
 0x1b0   : > { %v1969_v43 = vpop.f32.mrf.mxu1  ;;  %3607 = vmatprep.subr.bf16.mxu0 %v5010_v32 }
 0x1b1   : > { %v1975_v44 = vmax.f32 %v1968_v41, 0.0  ;;  %v1978_v47 = vpack.c.bf16 %v1974_v42, %v1974_v42  ;;  %v4963_v42 = vld [vmem:[%s6906_s6 + $0x28] ss:$16 sps:$4 sm:$0xff]  }
 0x1b2   : > { %v1970_v45 = vpop.f32.mrf.mxu1 }
 0x1b3   : > { %v1979_v46 = vpack.c.bf16 %v1975_v44, %v1975_v44  ;;  %3608 = vmatpush2.bf16.msra.mxu0 %v5008_v34  ;;  %v4968_v44 = vld [vmem:[%s6906_s6 + $0xc] ss:$16 sps:$4 sm:$0xff]   ;;  %v4966_v45 = vld [vmem:[%s6906_s6 + $0x8] ss:$16 sps:$4 sm:$0xff]  }
 0x1b4   : > { %3609 = vmatprep.subr.bf16.mxu0 %v5016_v33  ;;  %v5047_v34 = vld [vmem:[%s6908_s8 + $0x4d8] ss:$28 sps:$4 sm:$0xff]  }
 0x1b5   : > { %4336 = vmatprep.mubr.msk.bf16.mxu1 %vm1640_vm0, %v1979_v46  ;;  %v5001_v46 = vld [vmem:[%s6908_s8 + $0x50c] ss:$28 sps:$4 sm:$0xff]  }
 0x1b6   : > { %2263 = vmatmul.mubr.bf16.vlgmr.msra.gmra.mxu1 %v1978_v47  ;;  %v4999_v47 = vld [vmem:[%s6908_s8 + $0x508] ss:$28 sps:$4 sm:$0xff]  }
 0x1b7   : > { %2387 = vmatprep.mubr.bf16.mxu1 %v5342_v13  ;;  %2368 = vmatpush1.bf16.msra.mxu1 %v4957_v48  ;;  %v5007_v48 = vld [vmem:[%s6908_s8 + $0x4d4] ss:$28 sps:$4 sm:$0xff]  }
 0x1b8   : > { %2369 = vmatprep.subr.bf16.mxu1 %v4962_v4  ;;  %3610 = vmatpush2.bf16.msra.mxu0 %v5014_v35  ;;  %v5040_v4 = vld [vmem:[%s6908_s8 + $0x384] ss:$28 sps:$4 sm:$0xff]  }
 0x1b9   : > { %3611 = vmatprep.subr.bf16.mxu0 %v5022_v36  ;;  %v5055_v36 = vld [vmem:[%s6908_s8 + $0x4a4] ss:$28 sps:$4 sm:$0xff]  }
 0x1bb   : > { %2370 = vmatpush1.bf16.msra.mxu1 %v4960_v5  ;;  %v5043_v5 = vld [vmem:[%s6908_s8 + $0x514] ss:$28 sps:$4 sm:$0xff]  }
 0x1bc   : > { %2408 = vmatprep.subr.bf16.mxu1 %v4965_v8  ;;  %3612 = vmatpush2.bf16.msra.mxu0 %v5020_v37  ;;  %v5038_v8 = vld [vmem:[%s6908_s8 + $0x380] ss:$28 sps:$4 sm:$0xff]  }
 0x227   : > { %v4554_v50 = vpop.f32.mrf.mxu0 }
 0x229   : > { %v4555_v51 = vpop.f32.mrf.mxu0 }
 0x22a   : > { %v4556_v53 = vadd.f32 %v4555_v51, %v4554_v50  ;;  %v5013_v50 = vld [vmem:[%s6908_s8 + $0x49c] ss:$28 sps:$4 sm:$0xff]  }
 0x22b   : > { %v4557_v54 = vpop.f32.mrf.mxu0  ;;  %v5011_v51 = vld [vmem:[%s6908_s8 + $0x498] ss:$28 sps:$4 sm:$0xff]  }
 0x22c   : > { %v2225_v57 = vadd.f32 %v4556_v53, %v4310_v56  ;;  %v5019_v53 = vld [vmem:[%s6908_s8 + $0x464] ss:$28 sps:$4 sm:$0xff]  }
 0x22d   : > { %v4558_v55 = vpop.f32.mrf.mxu0  ;;  %v5017_v54 = vld [vmem:[%s6908_s8 + $0x460] ss:$28 sps:$4 sm:$0xff]   ;;  %v5023_v56 = vld [vmem:[%s6908_s8 + $0x428] ss:$28 sps:$4 sm:$0xff]  }
 0x22e   : > { %v5025_v55 = vld [vmem:[%s6908_s8 + $0x42c] ss:$28 sps:$4 sm:$0xff]  }
 0x276   : > { %v2264_v60 = vpop.f32.mrf.mxu1 }
 0x277   : > { %v6211_v62 = vadd.f32 %v2264_v60, %v2225_v57  ;;  %v5028_v57 = vld [vmem:[%s6908_s8 + $0x1fc] ss:$28 sps:$4 sm:$0xff]   ;;  %v5031_v60 = vld [vmem:[%s6908_s8 + $0x3f4] ss:$28 sps:$4 sm:$0xff]  }
 0x278   : > { %v2266_v63 = vpop.f32.mrf.mxu1  ;;  %3613 = vmatprep.subr.bf16.mxu0 %v5028_v57  ;;  %v5079_v57 = vld [vmem:[%s6908_s8 + $0x3c4] ss:$28 sps:$4 sm:$0xff]  }
 0x279   : > { %v2270_v0 = vmul.f32 0.5, %v6211_v62  ;;  %3961 = vst.msk [vmem:[%s6214_s29] sm:$0xff] %vm3960_vm1, %v6211_v62  ;;  %v5029_v63 = vld [vmem:[%s6908_s8 + $0x3f0] ss:$28 sps:$4 sm:$0xff]  }
 0x27a   : > { %v2267_v1 = vpop.f32.mrf.mxu1 }
 0x27b   : > { %v2271_v2 = vmul.f32 1.442695, %v2270_v0  ;;  %v5034_v0 = vld [vmem:[%s6908_s8 + $0x1c4] ss:$28 sps:$4 sm:$0xff]   ;;  %v5037_v1 = vld [vmem:[%s6908_s8 + $0x3bc] ss:$28 sps:$4 sm:$0xff]  }
 0x27c   : > { %v2268_v3 = vpop.f32.mrf.mxu1 }
 0x27d   : > { %5219 = vpow2.f32 %v2271_v2  ;;  %v5032_v2 = vld [vmem:[%s6908_s8 + $0x1c0] ss:$28 sps:$4 sm:$0xff]   ;;  %v5035_v3 = vld [vmem:[%s6908_s8 + $0x3b8] ss:$28 sps:$4 sm:$0xff]  }
 0x28a   : > { %v5220_v9 = vpop.eup %5219 }
 0x28b   : > { %2275 = vrot.lane.b32.xlu0 %v5220_v9, %s5343_s16  ;;  %s412_s16 = scalar_lea.vmem %s6923_s1, %s4104_s14  ;;  %v5046_v9 = vld [vmem:[%s6908_s8 + $0x544] ss:$28 sps:$4 sm:$0xff]   ;;  %s4582_s14 = smul.u32 56, %s6205_s23 }
 0x28c   : > { %v2273_v38 = vld [vmem:[%s412_s16] sm:$0xff] }
 0x28d   : > { %s6821_s15 = scalar_lea.vmem [#allocation2], %s4582_s14  ;;  %s5256_s14 = scalar_lea.vmem %s5255_s13, 256 }
 0x28e   : > { %p5258_p1 = scmp.lt.s32.totalorder %s5256_s14, %s5250_s12 }
 0x290   : > { %p5259_p2 = por %p5258_p1, %p5257_p0 }
 0x292   : > { %p5260_p3 = pnand %p5259_p2, %p5253_p13 }
 0x2fd   : > { %v2276_v39 = vpop.permute.xlu0 %2275 }
 0x2fe   : > { %v2278_v40 = vmul.f32 %v2276_v39, %v2273_v38 }
 0x300   : > { %v2279_v41 = vadd.f32 %v2278_v40, %v6211_v62  ;;  %v5026_v62 = vld [vmem:[%s6908_s8 + $0x1f8] ss:$28 sps:$4 sm:$0xff]   ;;  %v5050_v40 = vld [vmem:[%s6908_s8 + $0x190] ss:$28 sps:$4 sm:$0xff]  }
 0x301   : > { %3614 = vmatpush2.bf16.msra.mxu0 %v5026_v62  ;;  %v5077_v62 = vld [vmem:[%s6908_s8 + $0x3c0] ss:$28 sps:$4 sm:$0xff]  }
 0x302   : > { %v2280_v43 = vpack.c.bf16 %v2279_v41, %v2279_v41  ;;  %3615 = vmatprep.subr.bf16.mxu0 %v5034_v0  ;;  %v5053_v41 = vld [vmem:[%s6908_s8 + $0x4a0] ss:$28 sps:$4 sm:$0xff]   ;;  %v5085_v0 = vld [vmem:[%s6908_s8 + $0x38c] ss:$28 sps:$4 sm:$0xff]  }
 0x304   : > { %4345 = vmatmul.mubr.msk.bf16.vlgmr.msra.gmra.mxu1 %vm2351_vm2, %v2280_v43 }
 0x305   : > { %2409 = vmatpush1.bf16.msra.mxu1 %v4963_v42  ;;  %2428 = vmatprep.mubr.bf16.mxu1 %v5342_v13 }
 0x306   : > { %2410 = vmatprep.subr.bf16.mxu1 %v4968_v44  ;;  %3616 = vmatpush2.bf16.msra.mxu0 %v5032_v2  ;;  %v5061_v44 = vld [vmem:[%s6908_s8 + $0x46c] ss:$28 sps:$4 sm:$0xff]  }
 0x307   : > { %3708 = vmatprep.subr.bf16.mxu0 %v5043_v5  ;;  %v5083_v2 = vld [vmem:[%s6908_s8 + $0x388] ss:$28 sps:$4 sm:$0xff]   ;;  %v5086_v5 = vld [vmem:[%s6908_s8 + $0x40] ss:$28 sps:$4 sm:$0xff]  }
 0x309   : > { %2411 = vmatpush1.bf16.msra.mxu1 %v4966_v45  ;;  %v5056_v45 = vld [vmem:[%s6908_s8 + $0x158] ss:$28 sps:$4 sm:$0xff]  }
 0x30a   : > { %3626 = vmatprep.subr.bf16.mxu1 %v5001_v46  ;;  %v5059_v46 = vld [vmem:[%s6908_s8 + $0x468] ss:$28 sps:$4 sm:$0xff]  }
 0x30c   : > { %4346 = vmatmul.mubr.msk.bf16.vlgmr.msra.gmra.mxu1 %vm2351_vm2, %v2280_v43  ;;  %v5058_v43 = vld [vmem:[%s6908_s8 + $0x15c] ss:$28 sps:$4 sm:$0xff]  }
 0x30d   : > { %3627 = vmatpush1.bf16.msra.mxu1 %v4999_v47  ;;  %v5064_v47 = vld [vmem:[%s6908_s8 + $0x124] ss:$28 sps:$4 sm:$0xff]  }
 0x30e   : > { %3628 = vmatprep.subr.bf16.mxu1 %v5007_v48  ;;  %v5067_v48 = vld [vmem:[%s6908_s8 + $0x434] ss:$28 sps:$4 sm:$0xff]  }
 0x311   : > { %3629 = vmatpush1.bf16.msra.mxu1 %v5005_v49  ;;  %v5062_v49 = vld [vmem:[%s6908_s8 + $0x120] ss:$28 sps:$4 sm:$0xff]  }
 0x312   : > { %3630 = vmatprep.subr.bf16.mxu1 %v5013_v50  ;;  %v5065_v50 = vld [vmem:[%s6908_s8 + $0x430] ss:$28 sps:$4 sm:$0xff]  }
 0x315   : > { %3631 = vmatpush1.bf16.msra.mxu1 %v5011_v51  ;;  %v5070_v51 = vld [vmem:[%s6908_s8 + $0xec] ss:$28 sps:$4 sm:$0xff]  }
 0x316   : > { %3632 = vmatprep.subr.bf16.mxu1 %v5019_v53  ;;  %v5073_v53 = vld [vmem:[%s6908_s8 + $0x3fc] ss:$28 sps:$4 sm:$0xff]  }
 0x319   : > { %3633 = vmatpush1.bf16.msra.mxu1 %v5017_v54  ;;  %v5068_v54 = vld [vmem:[%s6908_s8 + $0xe8] ss:$28 sps:$4 sm:$0xff]  }
 0x31a   : > { %3634 = vmatprep.subr.bf16.mxu1 %v5025_v55  ;;  %v5071_v55 = vld [vmem:[%s6908_s8 + $0x3f8] ss:$28 sps:$4 sm:$0xff]  }
 0x31d   : > { %3635 = vmatpush1.bf16.msra.mxu1 %v5023_v56  ;;  %v5076_v56 = vld [vmem:[%s6908_s8 + $0xb4] ss:$28 sps:$4 sm:$0xff]  }
 0x31e   : > { %3636 = vmatprep.subr.bf16.mxu1 %v5031_v60  ;;  %v5074_v60 = vld [vmem:[%s6908_s8 + $0xb0] ss:$28 sps:$4 sm:$0xff]  }
 0x321   : > { %3637 = vmatpush1.bf16.msra.mxu1 %v5029_v63  ;;  %v5082_v63 = vld [vmem:[%s6908_s8 + $0x7c] ss:$28 sps:$4 sm:$0xff]  }
 0x322   : > { %3638 = vmatprep.subr.bf16.mxu1 %v5037_v1  ;;  %v5080_v1 = vld [vmem:[%s6908_s8 + $0x78] ss:$28 sps:$4 sm:$0xff]  }
 0x325   : > { %3639 = vmatpush1.bf16.msra.mxu1 %v5035_v3  ;;  %v5088_v3 = vld [vmem:[%s6908_s8 + $0x44] ss:$28 sps:$4 sm:$0xff]  }
 0x326   : > { %3640 = vmatprep.subr.bf16.mxu1 %v5040_v4  ;;  %v5091_v4 = vld [vmem:[%s6908_s8 + $0x54c] ss:$28 sps:$4 sm:$0xff]  }
 0x329   : > { %3641 = vmatpush1.bf16.msra.mxu1 %v5038_v8  ;;  %v5089_v8 = vld [vmem:[%s6908_s8 + $0x548] ss:$28 sps:$4 sm:$0xff]  }
 0x32a   : > { %3656 = vmatprep.subr.bf16.mxu1 %v5046_v9  ;;  %v5094_v9 = vld [vmem:[%s6908_s8 + $0xc] ss:$28 sps:$4 sm:$0xff]  }
 0x32d   : > { %3657 = vmatpush2.bf16.msra.mxu1 %v5044_v10  ;;  %v5097_v10 = vld [vmem:[%s6908_s8 + $0x19c] ss:$28 sps:$4 sm:$0xff]  }
 0x32e   : > { %3667 = vmatprep.subr.bf16.mxu1 %v5052_v11  ;;  %v5092_v11 = vld [vmem:[%s6908_s8 + $0x8] ss:$28 sps:$4 sm:$0xff]  }
 0x3c4   : > { %v2389_v17 = vpop.f32.mrf.mxu1 }
 0x3c5   : > { %v2390_v18 = vadd.f32 %v2389_v17, %v2294_v15  ;;  %v5100_v15 = vld [vmem:[%s6908_s8 + $0x354] ss:$28 sps:$4 sm:$0xff]  }
 0x3c6   : > { %v2391_v19 = vpop.f32.mrf.mxu1  ;;  %v5098_v17 = vld [vmem:[%s6908_s8 + $0x350] ss:$28 sps:$4 sm:$0xff]  }
 0x3c7   : > { %v2392_v20 = vadd.f32 %v2391_v19, %v2298_v16  ;;  %v2437_v21 = vmax.f32 %v2390_v18, 0.0  ;;  %v5103_v16 = vld [vmem:[%s6908_s8 + $0x164] ss:$28 sps:$4 sm:$0xff]   ;;  %v5106_v19 = vld [vmem:[%s6908_s8 + $0x31c] ss:$28 sps:$4 sm:$0xff]  }
 0x3c8   : > { %v2393_v22 = vpop.f32.mrf.mxu1  ;;  %v5101_v18 = vld [vmem:[%s6908_s8 + $0x160] ss:$28 sps:$4 sm:$0xff]  }
 0x3c9   : > { %v2438_v23 = vmax.f32 %v2392_v20, 0.0  ;;  %v6410_v14 = vpack.c.bf16 %v2437_v21, %v2437_v21  ;;  %v5109_v20 = vld [vmem:[%s6908_s8 + $0x12c] ss:$28 sps:$4 sm:$0xff]   ;;  %v5104_v21 = vld [vmem:[%s6908_s8 + $0x318] ss:$28 sps:$4 sm:$0xff]  }
 0x3ca   : > { %v2394_v25 = vpop.f32.mrf.mxu1  ;;  %v5107_v22 = vld [vmem:[%s6908_s8 + $0x128] ss:$28 sps:$4 sm:$0xff]  }
 0x3cb   : > { %v6404_v7 = vpack.c.bf16 %v2438_v23, %v2438_v23  ;;  %v5112_v23 = vld [vmem:[%s6908_s8 + $0x2e4] ss:$28 sps:$4 sm:$0xff]  }
 0x3cc   : > { %v2430_v29 = vpop.f32.mrf.mxu1  ;;  %v5110_v25 = vld [vmem:[%s6908_s8 + $0x2e0] ss:$28 sps:$4 sm:$0xff]  }
 0x3cd   : > { %v2431_v6 = vadd.f32 %v2430_v29, %v2302_v24  ;;  %3617 = vmatprep.mubr.bf16.mxu0 %v6404_v7  ;;  %v5115_v24 = vld [vmem:[%s6908_s8 + $0xf4] ss:$28 sps:$4 sm:$0xff]   ;;  %v5121_v29 = vld [vmem:[%s6908_s8 + $0xbc] ss:$28 sps:$4 sm:$0xff]  }
 0x3ce   : > { %v2432_v31 = vpop.f32.mrf.mxu1  ;;  %3618 = vmatmul.mubr.bf16.vlgmr.msra.gmra.mxu0 %v6410_v14 }
 0x3cf   : > { %v2433_v32 = vadd.f32 %v2432_v31, %v2306_v28  ;;  %3709 = vmatpush1.bf16.msra.mxu0 %v5041_v52  ;;  %v2439_v33 = vmax.f32 %v2431_v6, 0.0  ;;  %v5113_v52 = vld [vmem:[%s6908_s8 + $0xf0] ss:$28 sps:$4 sm:$0xff]   ;;  %v5119_v6 = vld [vmem:[%s6908_s8 + $0xb8] ss:$28 sps:$4 sm:$0xff]  }
 0x3d0   : > { %v2434_v35 = vpop.f32.mrf.mxu1  ;;  %3710 = vmatprep.subr.bf16.mxu0 %v5049_v30  ;;  %v5118_v28 = vld [vmem:[%s6908_s8 + $0x2ac] ss:$28 sps:$4 sm:$0xff]   ;;  %v5124_v31 = vld [vmem:[%s6908_s8 + $0x274] ss:$28 sps:$4 sm:$0xff]  }
 0x3d1   : > { %v2440_v37 = vmax.f32 %v2433_v32, 0.0  ;;  %v6431_v42 = vpack.c.bf16 %v2439_v33, %v2439_v33  ;;  %v5116_v30 = vld [vmem:[%s6908_s8 + $0x2a8] ss:$28 sps:$4 sm:$0xff]   ;;  %v5125_v33 = vld [vmem:[%s6908_s8 + $0x80] ss:$28 sps:$4 sm:$0xff]  }
 0x3d2   : > { %v2435_v38 = vpop.f32.mrf.mxu1  ;;  %v5127_v32 = vld [vmem:[%s6908_s8 + $0x84] ss:$28 sps:$4 sm:$0xff]   ;;  %v5130_v35 = vld [vmem:[%s6908_s8 + $0x23c] ss:$28 sps:$4 sm:$0xff]  }
 0x3d3   : > { %v6423_v39 = vpack.c.bf16 %v2440_v37, %v2440_v37  ;;  %3711 = vmatpush1.bf16.msra.mxu0 %v5047_v34  ;;  %v5122_v34 = vld [vmem:[%s6908_s8 + $0x270] ss:$28 sps:$4 sm:$0xff]   ;;  %v5128_v37 = vld [vmem:[%s6908_s8 + $0x238] ss:$28 sps:$4 sm:$0xff]   ;;  %v5131_v38 = vld [vmem:[%s6908_s8 + $0x48] ss:$28 sps:$4 sm:$0xff]  }
 0x3d4   : > { %3712 = vmatprep.subr.bf16.mxu0 %v5055_v36  ;;  %v5133_v36 = vld [vmem:[%s6908_s8 + $0x4c] ss:$28 sps:$4 sm:$0xff]  }
 0x3d5   : > { %4522 = vmatprep.mubr.msk.bf16.mxu1 %vm1640_vm0, %v6423_v39  ;;  %4523 = vmatprep.mubr.msk.bf16.mxu0 %vm1640_vm0, %v6423_v39 }
 0x3d6   : > { %3659 = vmatmul.mubr.bf16.vlgmr.msra.gmra.mxu1 %v6431_v42 }
 0x3d7   : > { %3668 = vmatpush1.bf16.msra.mxu1 %v5050_v40  ;;  %3713 = vmatpush1.bf16.msra.mxu0 %v5053_v41  ;;  %v5136_v40 = vld [vmem:[%s6908_s8 + $0x204] ss:$28 sps:$4 sm:$0xff]   ;;  %v5139_v41 = vld [vmem:[%s6908_s8 + $0x14] ss:$28 sps:$4 sm:$0xff]  }
 0x3d8   : > { %3699 = vmatprep.mubr.bf16.mxu1 %v6404_v7  ;;  %3669 = vmatprep.subr.bf16.mxu1 %v5058_v43  ;;  %v5134_v43 = vld [vmem:[%s6908_s8 + $0x200] ss:$28 sps:$4 sm:$0xff]  }
 0x3d9   : > { %3714 = vmatprep.subr.bf16.mxu0 %v5061_v44  ;;  %v5137_v44 = vld [vmem:[%s6908_s8 + $0x10] ss:$28 sps:$4 sm:$0xff]  }
 0x3db   : > { %3670 = vmatpush1.bf16.msra.mxu1 %v5056_v45  ;;  %3715 = vmatpush1.bf16.msra.mxu0 %v5059_v46  ;;  %v5142_v45 = vld [vmem:[%s6908_s8 + $0x1cc] ss:$28 sps:$4 sm:$0xff]   ;;  %v5145_v46 = vld [vmem:[%s6908_s8 + $0x35c] ss:$28 sps:$4 sm:$0xff]  }
 0x3dc   : > { %3671 = vmatprep.subr.bf16.mxu1 %v5064_v47  ;;  %3716 = vmatprep.subr.bf16.mxu0 %v5067_v48  ;;  %v5140_v47 = vld [vmem:[%s6908_s8 + $0x1c8] ss:$28 sps:$4 sm:$0xff]   ;;  %v5143_v48 = vld [vmem:[%s6908_s8 + $0x358] ss:$28 sps:$4 sm:$0xff]  }
 0x3df   : > { %3672 = vmatpush1.bf16.msra.mxu1 %v5062_v49  ;;  %3717 = vmatpush1.bf16.msra.mxu0 %v5065_v50  ;;  %v5148_v49 = vld [vmem:[%s6908_s8 + $0x324] ss:$28 sps:$4 sm:$0xff]   ;;  %v5151_v50 = vld [vmem:[%s6908_s8 + $0x51c] ss:$28 sps:$4 sm:$0xff]  }
 0x3e0   : > { %3673 = vmatprep.subr.bf16.mxu1 %v5070_v51  ;;  %3718 = vmatprep.subr.bf16.mxu0 %v5073_v53  ;;  %v5146_v51 = vld [vmem:[%s6908_s8 + $0x320] ss:$28 sps:$4 sm:$0xff]   ;;  %v5149_v53 = vld [vmem:[%s6908_s8 + $0x518] ss:$28 sps:$4 sm:$0xff]  }
 0x3e3   : > { %3674 = vmatpush1.bf16.msra.mxu1 %v5068_v54  ;;  %3719 = vmatpush1.bf16.msra.mxu0 %v5071_v55  ;;  %v5154_v54 = vld [vmem:[%s6908_s8 + $0x2ec] ss:$28 sps:$4 sm:$0xff]   ;;  %v5157_v55 = vld [vmem:[%s6908_s8 + $0x4e4] ss:$28 sps:$4 sm:$0xff]  }
 0x3e4   : > { %3675 = vmatprep.subr.bf16.mxu1 %v5076_v56  ;;  %3720 = vmatprep.subr.bf16.mxu0 %v5079_v57  ;;  %v5152_v56 = vld [vmem:[%s6908_s8 + $0x2e8] ss:$28 sps:$4 sm:$0xff]   ;;  %v5155_v57 = vld [vmem:[%s6908_s8 + $0x4e0] ss:$28 sps:$4 sm:$0xff]  }
 0x3e7   : > { %3676 = vmatpush1.bf16.msra.mxu1 %v5074_v60  ;;  %3721 = vmatpush1.bf16.msra.mxu0 %v5077_v62  ;;  %v5160_v60 = vld [vmem:[%s6908_s8 + $0x2b4] ss:$28 sps:$4 sm:$0xff]   ;;  %v5163_v62 = vld [vmem:[%s6908_s8 + $0x4ac] ss:$28 sps:$4 sm:$0xff]  }
 0x3e8   : > { %3677 = vmatprep.subr.bf16.mxu1 %v5082_v63  ;;  %3722 = vmatprep.subr.bf16.mxu0 %v5085_v0  ;;  %v5158_v63 = vld [vmem:[%s6908_s8 + $0x2b0] ss:$28 sps:$4 sm:$0xff]   ;;  %v5161_v0 = vld [vmem:[%s6908_s8 + $0x4a8] ss:$28 sps:$4 sm:$0xff]  }
 0x3eb   : > { %3678 = vmatpush1.bf16.msra.mxu1 %v5080_v1  ;;  %3723 = vmatpush1.bf16.msra.mxu0 %v5083_v2  ;;  %v5166_v1 = vld [vmem:[%s6908_s8 + $0x27c] ss:$28 sps:$4 sm:$0xff]   ;;  %v5169_v2 = vld [vmem:[%s6908_s8 + $0x474] ss:$28 sps:$4 sm:$0xff]  }
 0x3ec   : > { %3679 = vmatprep.subr.bf16.mxu1 %v5088_v3  ;;  %3738 = vmatprep.subr.bf16.mxu0 %v5091_v4  ;;  %v5164_v3 = vld [vmem:[%s6908_s8 + $0x278] ss:$28 sps:$4 sm:$0xff]   ;;  %v5167_v4 = vld [vmem:[%s6908_s8 + $0x470] ss:$28 sps:$4 sm:$0xff]  }
 0x3ef   : > { %3680 = vmatpush1.bf16.msra.mxu1 %v5086_v5  ;;  %3739 = vmatpush2.bf16.msra.mxu0 %v5089_v8  ;;  %v5172_v5 = vld [vmem:[%s6908_s8 + $0x244] ss:$28 sps:$4 sm:$0xff]   ;;  %v5175_v8 = vld [vmem:[%s6908_s8 + $0x43c] ss:$28 sps:$4 sm:$0xff]  }
 0x3f0   : > { %3681 = vmatprep.subr.bf16.mxu1 %v5094_v9  ;;  %3749 = vmatprep.subr.bf16.mxu0 %v5097_v10  ;;  %v5170_v9 = vld [vmem:[%s6908_s8 + $0x240] ss:$28 sps:$4 sm:$0xff]   ;;  %v5173_v10 = vld [vmem:[%s6908_s8 + $0x438] ss:$28 sps:$4 sm:$0xff]  }
 0x3f2   : > { %3741 = vmatmul.mubr.bf16.vlgmr.msra.gmra.mxu0 %v6431_v42 }
 0x3f3   : > { %3682 = vmatpush1.bf16.msra.mxu1 %v5092_v11  ;;  %3750 = vmatpush1.bf16.msra.mxu0 %v5095_v12  ;;  %v5178_v11 = vld [vmem:[%s6908_s8 + $0x20c] ss:$28 sps:$4 sm:$0xff]   ;;  %v5181_v12 = vld [vmem:[%s6908_s8 + $0x404] ss:$28 sps:$4 sm:$0xff]  }
 0x3f4   : > { %3781 = vmatprep.mubr.bf16.mxu0 %v6404_v7  ;;  %3683 = vmatprep.subr.bf16.mxu1 %v5100_v15  ;;  %v5176_v15 = vld [vmem:[%s6908_s8 + $0x208] ss:$28 sps:$4 sm:$0xff]  }
 0x3f5   : > { %3751 = vmatprep.subr.bf16.mxu0 %v5103_v16  ;;  %v5179_v16 = vld [vmem:[%s6908_s8 + $0x400] ss:$28 sps:$4 sm:$0xff]  }
 0x3f7   : > { %3684 = vmatpush2.bf16.msra.mxu1 %v5098_v17  ;;  %3752 = vmatpush1.bf16.msra.mxu0 %v5101_v18  ;;  %v5184_v17 = vld [vmem:[%s6908_s8 + $0x1d4] ss:$28 sps:$4 sm:$0xff]   ;;  %v5187_v18 = vld [vmem:[%s6908_s8 + $0x3cc] ss:$28 sps:$4 sm:$0xff]  }
 0x3f8   : > { %3685 = vmatprep.subr.bf16.mxu1 %v5106_v19  ;;  %3753 = vmatprep.subr.bf16.mxu0 %v5109_v20  ;;  %v5182_v19 = vld [vmem:[%s6908_s8 + $0x1d0] ss:$28 sps:$4 sm:$0xff]   ;;  %v5185_v20 = vld [vmem:[%s6908_s8 + $0x3c8] ss:$28 sps:$4 sm:$0xff]  }
 0x3fb   : > { %3686 = vmatpush2.bf16.msra.mxu1 %v5104_v21  ;;  %3754 = vmatpush1.bf16.msra.mxu0 %v5107_v22  ;;  %v5190_v21 = vld [vmem:[%s6908_s8 + $0x394] ss:$28 sps:$4 sm:$0xff]  }
 0x3fc   : > { %3687 = vmatprep.subr.bf16.mxu1 %v5112_v23  ;;  %3755 = vmatprep.subr.bf16.mxu0 %v5115_v24  ;;  %v5188_v22 = vld [vmem:[%s6908_s8 + $0x390] ss:$28 sps:$4 sm:$0xff]   ;;  %v5191_v23 = vld [vmem:[%s6908_s8 + $0x520] ss:$28 sps:$4 sm:$0xff]  }
 0x3fd   : > { %v5194_v24 = vld [vmem:[%s6908_s8 + $0x554] ss:$28 sps:$4 sm:$0xff]  }
 0x3ff   : > { %3688 = vmatpush2.bf16.msra.mxu1 %v5110_v25  ;;  %3756 = vmatpush1.bf16.msra.mxu0 %v5113_v52  ;;  %v5192_v25 = vld [vmem:[%s6908_s8 + $0x550] ss:$28 sps:$4 sm:$0xff]   ;;  %v5195_v52 = vld [vmem:[%s6908_s8 + $0x4e8] ss:$28 sps:$4 sm:$0xff]  }
 0x400   : > { %3689 = vmatprep.subr.bf16.mxu1 %v5118_v28  ;;  %3757 = vmatprep.subr.bf16.mxu0 %v5121_v29  ;;  %v5196_v28 = vld [vmem:[%s6908_s8 + $0x360] ss:$28 sps:$4 sm:$0xff]  }
 0x401   : > { %v5197_v29 = vld [vmem:[%s6908_s8 + $0x1a0] ss:$28 sps:$4 sm:$0xff]  }
 0x403   : > { %3690 = vmatpush2.bf16.msra.mxu1 %v5116_v30  ;;  %3758 = vmatpush1.bf16.msra.mxu0 %v5119_v6  ;;  %v5199_v30 = vld [vmem:[%s6908_s8 + $0x328] ss:$28 sps:$4 sm:$0xff]  }
 0x404   : > { %3691 = vmatprep.subr.bf16.mxu1 %v5124_v31  ;;  %3759 = vmatprep.subr.bf16.mxu0 %v5127_v32  ;;  %v5200_v6 = vld [vmem:[%s6908_s8 + $0x168] ss:$28 sps:$4 sm:$0xff]   ;;  %v5201_v31 = vld [vmem:[%s6908_s8 + $0x478] ss:$28 sps:$4 sm:$0xff]   ;;  %v5202_v32 = vld [vmem:[%s6908_s8 + $0x2f0] ss:$28 sps:$4 sm:$0xff]  }
 0x407   : > { %3692 = vmatpush2.bf16.msra.mxu1 %v5122_v34  ;;  %3760 = vmatpush1.bf16.msra.mxu0 %v5125_v33  ;;  %v5204_v34 = vld [vmem:[%s6908_s8 + $0x440] ss:$28 sps:$4 sm:$0xff]   ;;  %v5205_v33 = vld [vmem:[%s6908_s8 + $0x2b8] ss:$28 sps:$4 sm:$0xff]  }
 0x408   : > { %3693 = vmatprep.subr.bf16.mxu1 %v5130_v35  ;;  %3761 = vmatprep.subr.bf16.mxu0 %v5133_v36  ;;  %v5206_v35 = vld [vmem:[%s6908_s8 + $0xf8] ss:$28 sps:$4 sm:$0xff]   ;;  %v5207_v36 = vld [vmem:[%s6908_s8 + $0x408] ss:$28 sps:$4 sm:$0xff]  }
 0x40b   : > { %3694 = vmatpush2.bf16.msra.mxu1 %v5128_v37  ;;  %3762 = vmatpush1.bf16.msra.mxu0 %v5131_v38  ;;  %v5208_v37 = vld [vmem:[%s6908_s8 + $0x280] ss:$28 sps:$4 sm:$0xff]  }
 0x40c   : > { %3695 = vmatprep.subr.bf16.mxu1 %v5136_v40  ;;  %3763 = vmatprep.subr.bf16.mxu0 %v5139_v41  ;;  %v5209_v38 = vld [vmem:[%s6908_s8 + $0xc0] ss:$28 sps:$4 sm:$0xff]   ;;  %v5210_v40 = vld [vmem:[%s6908_s8 + $0x3d0] ss:$28 sps:$4 sm:$0xff]   ;;  %v5211_v41 = vld [vmem:[%s6908_s8 + $0x248] ss:$28 sps:$4 sm:$0xff]  }
 0x40f   : > { %3696 = vmatpush2.bf16.msra.mxu1 %v5134_v43  ;;  %3764 = vmatpush1.bf16.msra.mxu0 %v5137_v44  ;;  %v5212_v43 = vld [vmem:[%s6908_s8 + $0x88] ss:$28 sps:$4 sm:$0xff]   ;;  %v5213_v44 = vld [vmem:[%s6908_s8 + $0x398] ss:$28 sps:$4 sm:$0xff]  }
 0x410   : > { %3697 = vmatprep.subr.bf16.mxu1 %v5142_v45  ;;  %3765 = vmatprep.subr.bf16.mxu0 %v5145_v46  ;;  %v5214_v45 = vld [vmem:[%s6908_s8 + $0x210] ss:$28 sps:$4 sm:$0xff]  }
 0x411   : > { %v5215_v46 = vld [vmem:[%s6908_s8 + $0x50] ss:$28 sps:$4 sm:$0xff]  }
 0x413   : > { %3698 = vmatpush2.bf16.msra.mxu1 %v5140_v47  ;;  %3766 = vmatpush2.bf16.msra.mxu0 %v5143_v48  ;;  %v5216_v47 = vld [vmem:[%s6908_s8 + $0x558] ss:$28 sps:$4 sm:$0xff]  }
 0x414   : > { %3767 = vmatprep.subr.bf16.mxu0 %v5148_v49  ;;  %3790 = vmatprep.subr.bf16.mxu1 %v5151_v50  ;;  %v5217_v48 = vld [vmem:[%s6908_s8 + $0x1d8] ss:$28 sps:$4 sm:$0xff]   ;;  %v6814_v50 = vld [vmem:[%s6909_s9] sm:$0x7f] }
 0x415   : > { %v5218_v49 = vld [vmem:[%s6908_s8 + $0x18] ss:$28 sps:$4 sm:$0xff]  }
 0x416   : > { %3700 = vmatmul.mubr.bf16.vlgmr.msra.gmra.mxu1 %v6410_v14 }
 0x417   : > { %3768 = vmatpush2.bf16.msra.mxu0 %v5146_v51  ;;  %3791 = vmatpush1.bf16.msra.mxu1 %v5149_v53 }
 0x418   : > { %4524 = vmatprep.mubr.msk.bf16.mxu1 %vm1640_vm0, %v6423_v39  ;;  %3769 = vmatprep.subr.bf16.mxu0 %v5154_v54 }
 0x419   : > { %3792 = vmatprep.subr.bf16.mxu1 %v5157_v55  ;;  %v2654_v55 = vrot.slane %v6814_v50, %v6184_v61 }
 0x41b   : > { %3770 = vmatpush2.bf16.msra.mxu0 %v5152_v56  ;;  %3793 = vmatpush1.bf16.msra.mxu1 %v5155_v57 }
 0x41c   : > { %3771 = vmatprep.subr.bf16.mxu0 %v5160_v60  ;;  %3794 = vmatprep.subr.bf16.mxu1 %v5163_v62 }
 0x41f   : > { %3772 = vmatpush2.bf16.msra.mxu0 %v5158_v63  ;;  %3795 = vmatpush1.bf16.msra.mxu1 %v5161_v0 }
 0x420   : > { %3773 = vmatprep.subr.bf16.mxu0 %v5166_v1  ;;  %3796 = vmatprep.subr.bf16.mxu1 %v5169_v2 }
 0x423   : > { %3774 = vmatpush2.bf16.msra.mxu0 %v5164_v3  ;;  %3797 = vmatpush1.bf16.msra.mxu1 %v5167_v4 }
 0x424   : > { %3775 = vmatprep.subr.bf16.mxu0 %v5172_v5  ;;  %3798 = vmatprep.subr.bf16.mxu1 %v5175_v8 }
 0x427   : > { %3776 = vmatpush2.bf16.msra.mxu0 %v5170_v9  ;;  %3799 = vmatpush1.bf16.msra.mxu1 %v5173_v10 }
 0x428   : > { %3777 = vmatprep.subr.bf16.mxu0 %v5178_v11  ;;  %3800 = vmatprep.subr.bf16.mxu1 %v5181_v12 }
 0x42b   : > { %3778 = vmatpush2.bf16.msra.mxu0 %v5176_v15  ;;  %3801 = vmatpush1.bf16.msra.mxu1 %v5179_v16 }
 0x42c   : > { %3779 = vmatprep.subr.bf16.mxu0 %v5184_v17  ;;  %3802 = vmatprep.subr.bf16.mxu1 %v5187_v18 }
 0x42f   : > { %3780 = vmatpush2.bf16.msra.mxu0 %v5182_v19  ;;  %3803 = vmatpush1.bf16.msra.mxu1 %v5185_v20 }
 0x430   : > { %3804 = vmatprep.subr.bf16.mxu1 %v5190_v21  ;;  %3871 = vmatprep.subr.bf16.mxu0 %v5342_v13 }
 0x432   : > { %3782 = vmatmul.mubr.bf16.vlgmr.msra.gmra.mxu0 %v6410_v14 }
 0x433   : > { %3805 = vmatpush1.bf16.msra.mxu1 %v5188_v22  ;;  %3872 = vmatpush1.bf16.msra.mxu0 %v5191_v23 }
 0x434   : > { %4525 = vmatprep.mubr.msk.bf16.mxu0 %vm1640_vm0, %v6423_v39  ;;  %3820 = vmatprep.subr.bf16.mxu1 %v5194_v24  ;;  %v5198_v39 = vld [vmem:[%s6908_s8 + $0x4b0] ss:$28 sps:$4 sm:$0xff]  }
 0x435   : > { %3873 = vmatprep.subr.bf16.mxu0 %v5342_v13 }
 0x437   : > { %3821 = vmatpush2.bf16.msra.mxu1 %v5192_v25  ;;  %3874 = vmatpush1.bf16.msra.mxu0 %v5195_v52 }
 0x438   : > { %4560 = vmatprep.subr.bf16.mxu1 %v5196_v28  ;;  %3875 = vmatprep.subr.bf16.mxu0 %v5342_v13 }
 0x43a   : > { %3823 = vmatmul.mubr.bf16.vlgmr.msra.gmra.mxu1 %v6431_v42 }
 0x43b   : > { %4561 = vmatpush3.bf16.msra.mxu1 %v5197_v29  ;;  %3863 = vmatprep.mubr.bf16.mxu1 %v6404_v7  ;;  %v5203_v7 = vld [vmem:[%s6908_s8 + $0x130] ss:$28 sps:$4 sm:$0xff]  }
 0x43c   : > { %3876 = vmatpush1.bf16.msra.mxu0 %v5198_v39  ;;  %4562 = vmatprep.subr.bf16.mxu1 %v5199_v30 }
 0x43d   : > { %3877 = vmatprep.subr.bf16.mxu0 %v5342_v13 }
 0x43f   : > { %4563 = vmatpush3.bf16.msra.mxu1 %v5200_v6 }
 0x440   : > { %3878 = vmatpush1.bf16.msra.mxu0 %v5201_v31  ;;  %4564 = vmatprep.subr.bf16.mxu1 %v5202_v32 }
 0x441   : > { %3879 = vmatprep.subr.bf16.mxu0 %v5342_v13 }
 0x443   : > { %4565 = vmatpush3.bf16.msra.mxu1 %v5203_v7 }
 0x444   : > { %3880 = vmatpush1.bf16.msra.mxu0 %v5204_v34  ;;  %4566 = vmatprep.subr.bf16.mxu1 %v5205_v33 }
 0x445   : > { %3881 = vmatprep.subr.bf16.mxu0 %v5342_v13 }
 0x447   : > { %4567 = vmatpush3.bf16.msra.mxu1 %v5206_v35 }
 0x448   : > { %3882 = vmatpush1.bf16.msra.mxu0 %v5207_v36  ;;  %4568 = vmatprep.subr.bf16.mxu1 %v5208_v37 }
 0x449   : > { %3883 = vmatprep.subr.bf16.mxu0 %v5342_v13 }
 0x44b   : > { %4569 = vmatpush3.bf16.msra.mxu1 %v5209_v38 }
 0x44c   : > { %3884 = vmatpush1.bf16.msra.mxu0 %v5210_v40  ;;  %4570 = vmatprep.subr.bf16.mxu1 %v5211_v41 }
 0x44d   : > { %3885 = vmatprep.subr.bf16.mxu0 %v5342_v13 }
 0x44f   : > { %4571 = vmatpush3.bf16.msra.mxu1 %v5212_v43 }
 0x450   : > { %3886 = vmatpush1.bf16.msra.mxu0 %v5213_v44  ;;  %4572 = vmatprep.subr.bf16.mxu1 %v5214_v45 }
 0x451   : > { %3901 = vmatprep.subr.bf16.mxu0 %v5342_v13  ;;  %v2650_v13 = vrot.slane %v6814_v50, %v6178_v59 }
 0x453   : > { %4573 = vmatpush3.bf16.msra.mxu1 %v5215_v46 }
 0x454   : > { %3902 = vmatpush2.bf16.msra.mxu0 %v5216_v47  ;;  %4574 = vmatprep.subr.bf16.mxu1 %v5217_v48 }
 0x457   : > { %3904 = vmatmul.mubr.bf16.vlgmr.msra.gmra.mxu0 %v6431_v42  ;;  %4575 = vmatpush3.bf16.msra.mxu1 %v5218_v49 }
 0x45a   : > { %3864 = vmatmul.mubr.bf16.vlgmr.msra.gmra.mxu1 %v6410_v14 }
 0x48e   : > { %v3619_v51 = vpop.f32.mrf.mxu0 }
 0x48f   : > { %v3620_v57 = vadd.f32 %v3619_v51, %v2650_v13 }
 0x490   : > { %v3621_v53 = vpop.f32.mrf.mxu0 }
 0x491   : > { %v3622_v60 = vadd.f32 %v3621_v53, %v2654_v55 }
 0x492   : > { %v3623_v54 = vpop.f32.mrf.mxu0 }
 0x494   : > { %v3624_v56 = vpop.f32.mrf.mxu0 }
 0x496   : > { %v3660_v42 = vpop.f32.mrf.mxu1 }
 0x497   : > { %v3661_v14 = vadd.f32 %v3660_v42, %v3620_v57 }
 0x498   : > { %v3662_v62 = vpop.f32.mrf.mxu1 }
 0x499   : > { %v4526_v63 = vmul.f32 -1.442695, %v3661_v14  ;;  %v3663_v0 = vadd.f32 %v3662_v62, %v3622_v60 }
 0x49a   : > { %v3664_v1 = vpop.f32.mrf.mxu1 }
 0x49b   : > { %5221 = vpow2.f32 %v4526_v63  ;;  %v4527_v2 = vmul.f32 -1.442695, %v3663_v0 }
 0x49c   : > { %v3665_v3 = vpop.f32.mrf.mxu1 }
 0x49d   : > { %5223 = vpow2.f32 %v4527_v2 }
 0x4a8   : > { %v5222_v4 = vpop.eup %5221 }
 0x4a9   : > { %v3932_v59 = vadd.f32 1.0, %v5222_v4 }
 0x4aa   : > { %v5224_v5 = vpop.eup %5223 }
 0x4ab   : > { %5225 = vrcp.f32 %v3932_v59  ;;  %v3933_v61 = vadd.f32 1.0, %v5224_v5 }
 0x4ad   : > { %5227 = vrcp.f32 %v3933_v61 }
 0x4b2   : > { %v3742_v8 = vpop.f32.mrf.mxu0 }
 0x4b4   : > { %v3744_v9 = vpop.f32.mrf.mxu0 }
 0x4b6   : > { %v3746_v10 = vpop.f32.mrf.mxu0 }
 0x4b8   : > { %v5226_v11 = vpop.eup %5225  ;;  %v3747_v12 = vpop.f32.mrf.mxu0 }
 0x4b9   : > { %3953 = vst [vmem:[%s6821_s15] sm:$0xff] %v5226_v11 }
 0x4ba   : > { %v5228_v15 = vpop.eup %5227 }
 0x4bb   : > { %3954 = vst [vmem:[%s6821_s15 + $0x8] sm:$0xff] %v5228_v15 }
 0x4bc   : > { %5263 = shalt.err (!%p5260_p3)
}
 0x4bd   : > { %s5264_s0 = scalar_lea.hbm %s3993_s22, 128  ;;  %s5268_s16 = scalar_lea.hbm %s6911_s11, 256 }
 0x4be   : > { %p5265_p4 = scmp.ne.s32.totalorder %s3993_s22, %s5264_s0  ;;  %p5269_p9 = scmp.lt.s32.totalorder %s3993_s22, %s6911_s11 }
 0x4bf   : > { %p5270_p10 = scmp.lt.s32.totalorder %s5268_s16, %s5264_s0 }
 0x4c0   : > { %p5266_p7 = pnand %p5265_p4, %p5444_p5 }
 0x4c1   : > { %p5271_p11 = por %p5270_p10, %p5269_p9 }
 0x4c2   : > { %p5267_p8 = pneg %p5266_p7 }
 0x4c4   : > { %p5272_p12 = pnand %p5271_p11, %p5267_p8 }
 0x4c6   : > { %5275 = shalt.err (!%p5272_p12)
}
 0x4c7   : > { %4586 = dma.vmem_to_hbm [thread:$0]  (%p5444_p5), %s3996_s24, 128, %s3993_s22, %s3968_s30   ;;  %v2658_v16 = vrot.slane %v6814_v50, %v6189_v26  ;;  %v2662_v17 = vrot.slane %v6814_v50, %v6192_v27  ;;  %v2665_v27 = vsub.s32 4, %v6175_v58  ;;  %v2669_v31 = vsub.s32 5, %v6175_v58 }
 0x4c8   : > { %v2673_v56 = vsub.s32 6, %v6175_v58  ;;  %s4584_s0 = smul.u32 896, %s5427_s21  ;;  %s3982_s1 = sshll.u32 %s6821_s15, 4  ;;  %s3983_s1 = int_to_ptr.vmem [resolvable:$true] %s3982_s1 }
 0x4c9   : > { %v2666_v7 = vrot.slane %v6814_v50, %v2665_v27  ;;  %v2670_v33 = vrot.slane %v6814_v50, %v2669_v31  ;;  %s3963_s12 = scalar_lea.sflag [#allocation3], %s6205_s23  ;;  %s5276_s26 = scalar_lea.vmem %s3983_s1, 896 }
 0x4ca   : > { %v2674_v14 = vrot.slane %v6814_v50, %v2673_v56  ;;  %s6862_s30 = scalar_lea.hbm %s6910_s10, %s4584_s0  ;;  %p5277_p13 = scmp.ne.s32.totalorder %s3983_s1, %s5276_s26 }
 0x4cb   : > { %s5345_s13 = smov [#allocation2]  }
 0x4cc   : > { %p5278_p0 = pnand %p5277_p13, %p5444_p5  ;;  %s5280_s14 = sshll.u32 %s5345_s13, 4  ;;  %s5281_s14 = int_to_ptr.vmem [resolvable:$false] %s5280_s14 }
 0x4cd   : > { %s5282_s21 = scalar_lea.vmem %s5281_s14, 1792  ;;  %p5283_p2 = scmp.lt.s32.totalorder %s3983_s1, %s5281_s14 }
 0x4ce   : > { %p5279_p1 = pneg %p5278_p0  ;;  %p5284_p3 = scmp.lt.s32.totalorder %s5282_s21, %s5276_s26 }
 0x4d0   : > { %p5285_p4 = por %p5284_p3, %p5283_p2 }
 0x4d2   : > { %p5286_p7 = pnand %p5285_p4, %p5279_p1 }
 0x4d6   : > { %v3701_v18 = vpop.f32.mrf.mxu1 }
 0x4d7   : > { %v3702_v19 = vadd.f32 %v3701_v18, %v2658_v16 }
 0x4d8   : > { %v3703_v20 = vpop.f32.mrf.mxu1 }
 0x4d9   : > { %v3743_v21 = vadd.f32 %v3742_v8, %v3702_v19  ;;  %v3704_v22 = vadd.f32 %v3703_v20, %v2662_v17 }
 0x4da   : > { %v3705_v23 = vpop.f32.mrf.mxu1 }
 0x4db   : > { %v4528_v24 = vmul.f32 -1.442695, %v3743_v21  ;;  %v3745_v25 = vadd.f32 %v3744_v9, %v3704_v22 }
 0x4dc   : > { %v3706_v52 = vpop.f32.mrf.mxu1 }
 0x4dd   : > { %5229 = vpow2.f32 %v4528_v24  ;;  %v4529_v28 = vmul.f32 -1.442695, %v3745_v25 }
 0x4df   : > { %5231 = vpow2.f32 %v4529_v28 }
 0x4ea   : > { %v5230_v29 = vpop.eup %5229 }
 0x4eb   : > { %v3934_v39 = vadd.f32 1.0, %v5230_v29 }
 0x4ec   : > { %v5232_v30 = vpop.eup %5231 }
 0x4ed   : > { %5233 = vrcp.f32 %v3934_v39  ;;  %v3935_v26 = vadd.f32 1.0, %v5232_v30 }
 0x4ef   : > { %5235 = vrcp.f32 %v3935_v26 }
 0x4f2   : > { %v3783_v6 = vpop.f32.mrf.mxu0 }
 0x4f3   : > { %v3784_v36 = vadd.f32 %v3783_v6, %v2666_v7 }
 0x4f4   : > { %v3785_v32 = vpop.f32.mrf.mxu0 }
 0x4f5   : > { %v3786_v40 = vadd.f32 %v3785_v32, %v2670_v33 }
 0x4f6   : > { %v3787_v34 = vpop.f32.mrf.mxu0 }
 0x4f8   : > { %v3788_v35 = vpop.f32.mrf.mxu0 }
 0x4fa   : > { %v5234_v37 = vpop.eup %5233  ;;  %v3824_v38 = vpop.f32.mrf.mxu1 }
 0x4fb   : > { %3955 = vst [vmem:[%s6821_s15 + $0x10] sm:$0xff] %v5234_v37  ;;  %v3825_v41 = vadd.f32 %v3824_v38, %v3784_v36 }
 0x4fc   : > { %v5236_v43 = vpop.eup %5235  ;;  %v3826_v44 = vpop.f32.mrf.mxu1 }
 0x4fd   : > { %3956 = vst [vmem:[%s6821_s15 + $0x18] sm:$0xff] %v5236_v43  ;;  %v4530_v45 = vmul.f32 -1.442695, %v3825_v41  ;;  %v3827_v46 = vadd.f32 %v3826_v44, %v3786_v40 }
 0x4fe   : > { %v3828_v47 = vpop.f32.mrf.mxu1 }
 0x4ff   : > { %5237 = vpow2.f32 %v4530_v45  ;;  %v4531_v48 = vmul.f32 -1.442695, %v3827_v46 }
 0x500   : > { %v3829_v49 = vpop.f32.mrf.mxu1 }
 0x501   : > { %5239 = vpow2.f32 %v4531_v48 }
 0x50c   : > { %v5238_v51 = vpop.eup %5237 }
 0x50d   : > { %v3936_v53 = vadd.f32 1.0, %v5238_v51 }
 0x50e   : > { %v5240_v13 = vpop.eup %5239 }
 0x50f   : > { %5241 = vrcp.f32 %v3936_v53  ;;  %v3937_v54 = vadd.f32 1.0, %v5240_v13 }
 0x511   : > { %5243 = vrcp.f32 %v3937_v54 }
 0x517   : > { %v3905_v55 = vpop.f32.mrf.mxu0 }
 0x519   : > { %v3907_v57 = vpop.f32.mrf.mxu0 }
 0x51a   : > { %v4576_v42 = vpop.f32.mrf.mxu1 }
 0x51b   : > { %v3908_v60 = vpop.f32.mrf.mxu0 }
 0x51c   : > { %v5242_v62 = vpop.eup %5241  ;;  %v4577_v63 = vpop.f32.mrf.mxu1 }
 0x51d   : > { %3957 = vst [vmem:[%s6821_s15 + $0x20] sm:$0xff] %v5242_v62  ;;  %v4578_v0 = vadd.f32 %v4577_v63, %v4576_v42  ;;  %v3909_v1 = vpop.f32.mrf.mxu0 }
 0x51e   : > { %v5244_v2 = vpop.eup %5243  ;;  %v4579_v3 = vpop.f32.mrf.mxu1 }
 0x51f   : > { %3958 = vst [vmem:[%s6821_s15 + $0x28] sm:$0xff] %v5244_v2  ;;  %v3866_v4 = vadd.f32 %v4578_v0, %v2674_v14 }
 0x520   : > { %v4580_v59 = vpop.f32.mrf.mxu1 }
 0x521   : > { %v3906_v58 = vadd.f32 %v3905_v55, %v3866_v4 }
 0x523   : > { %v4532_v5 = vmul.f32 -1.442695, %v3906_v58 }
 0x525   : > { %5245 = vpow2.f32 %v4532_v5 }
 0x532   : > { %v5246_v61 = vpop.eup %5245 }
 0x533   : > { %v3938_v50 = vadd.f32 1.0, %v5246_v61 }
 0x535   : > { %5247 = vrcp.f32 %v3938_v50 }
 0x542   : > { %v5248_v8 = vpop.eup %5247 }
 0x543   : > { %3959 = vst.msk [vmem:[%s6821_s15 + $0x30] sm:$0xff] %vm1640_vm0, %v5248_v8 }
 0x544   : > { %5289 = shalt.err (!%p5286_p7)
}
 0x545   : > { %s5290_s15 = scalar_lea.hbm %s6862_s30, 896  ;;  %s5294_s19 = scalar_lea.hbm %s6910_s10, 1792 }
 0x546   : > { %p5291_p8 = scmp.ne.s32.totalorder %s6862_s30, %s5290_s15  ;;  %p5295_p11 = scmp.lt.s32.totalorder %s6862_s30, %s6910_s10 }
 0x547   : > { %p5296_p12 = scmp.lt.s32.totalorder %s5294_s19, %s5290_s15 }
 0x548   : > { %p5292_p9 = pnand %p5291_p8, %p5444_p5 }
 0x549   : > { %p5297_p13 = por %p5296_p12, %p5295_p11 }
 0x54a   : > { %p5293_p10 = pneg %p5292_p9 }
 0x54c   : > { %p5298_p0 = pnand %p5297_p13, %p5293_p10 }
 0x54e   : > { %5301 = shalt.err (!%p5298_p0)
}
 0x54f   : > { %4585 = dma.vmem_to_hbm [thread:$0]  (%p5444_p5), %s3983_s1, 896, %s6862_s30, %s3963_s12  }
 0x550 PF: > { %p4596_p1 = scmp.ge.s32.totalorder %s5340_s20, 2  ;;  %s4007_s0 = sand.u32 1, %s5328_s17  }
 0x551   : > { %s4008_s22 = scalar_lea.sflag [#allocation3], %s4007_s0 }
 0x552   : > { %p4590_p2 = pnand %p4596_p1, %p5448_p6 }
 0x554   : > { %p4591_p3 = pneg %p4590_p2 }
 0x556   : > { %5319 = dma.done.wait (%p4591_p3), %s4008_s22, 896  }
 0x557   : > { %5321 = vsyncadd (%p4591_p3), %s4008_s22, 4294966400  ;;  %s4017_s24 = scalar_lea.sflag [#allocation5], %s4007_s0 }
 0x558   : > { %5323 = dma.done.wait (%p4591_p3), %s4017_s24, 128  }
 0x559   : > { %5325 = vsyncadd (%p4591_p3), %s4017_s24, 4294967168  ;;  %s6924_s20 = sld [smem:[#allocation9_spill]]  ;;  %s6927_s17 = smov %s5332_s18 }
 0x55a   : > { %s6925_s27 = sld [smem:[#allocation8_spill]] }
 0x55b   : > { %s6926_s19 = sld [smem:[#allocation10_spill]] }
 0x55f   : > { %p25_p5 = scmp.ge.s32.totalorder %s6924_s20, 4  }
 0x560   : > { %s6928_s18 = smov %s6925_s27 }
 0x561   :  { %27 = sbr.rel (!%p25_p5) target bundleno = 8 (0x8), region = 115 }
 0x566   :  { %4022 = vsyncpa [#allocation3], 1 }
 0x567   :  { %4024 = vsyncpa [#allocation3 + $0x1], 1 }
 0x568   :  { %4025 = vsyncpa [#allocation5], 1 }
 0x569   :  { %4027 = vsyncpa [#allocation5 + $0x1], 1 }

</bundles_post_ra>
